<compile_context>
chip_gen: v7x
topology: tpu7x:2x2x1
jax: 0.10.0
libtpu: 0.0.40
codegen_flags: <defaults>
</compile_context>

<pallas_src>
import jax
import jax.numpy as jnp
from jax.experimental import pallas as pl
from jax.experimental.pallas import tpu as pltpu


# ----------------------------------------------------------------------------
# Fused Pallas kernel: num_layers LSTM (unrolled over time) + tanh + Linear
# ----------------------------------------------------------------------------
def fused_forward_kernel(x_ref, *refs):
    """refs = (w0x, w0h, b0, w1x, w1h, b1, ..., wfc, bfc, o_ref).

    x_ref:  (B, T, I)   batch_first input, fully resident in VMEM
    w{l}x:  (in_l, 4H)  input->gates weight, transposed, gate cols [i,f,o,g]
    w{l}h:  (H,   4H)   hidden->gates weight, transposed, gate cols [i,f,o,g]
    b{l}:   (1,   4H)   b_ih + b_hh, gate cols [i,f,o,g]
    wfc:    (H, O)      final Linear weight (transposed)
    bfc:    (1, O)
    o_ref:  (B, O)      output
    """
    layer_refs = refs[:-3]
    wfc_ref, bfc_ref, o_ref = refs[-3:]
    num_layers = len(layer_refs) // 3

    B, T, I = x_ref.shape
    H = layer_refs[1].shape[0]            # w0h: (H, 4H)
    G = 4 * H

    # ---- layer 0: input projection for ALL timesteps in one deep matmul ----
    x2d = x_ref[...].reshape(B * T, I)                          # layout no-op
    pre0 = (jnp.dot(x2d, layer_refs[0][...],
                    preferred_element_type=jnp.float32)
            + layer_refs[2][...])                               # bias folded in
    pre0 = pre0.reshape(B, T, G)

    # ---- hoist weight loads / bias broadcasts out of the unrolled loop ----
    whs = [layer_refs[3 * l + 1][...] for l in range(num_layers)]
    wxs = [None] + [layer_refs[3 * l][...] for l in range(1, num_layers)]
    bs = [None] + [jnp.broadcast_to(layer_refs[3 * l + 2][...], (B, G))
                   for l in range(1, num_layers)]

    # Gate columns are ordered [i, f, o | g]: sigmoid on lanes [0, 3H),
    # tanh on lanes [3H, 4H) — one full-width select, no narrow activations.
    lane = jax.lax.broadcasted_iota(jnp.int32, (B, G), 1)
    sig_mask = lane < 3 * H

    def gates_to_state(gates, c):
        act = jnp.where(sig_mask, jax.nn.sigmoid(gates), jnp.tanh(gates))
        i_g = act[:, 0:H]
        f_g = act[:, H:2 * H]
        o_g = act[:, 2 * H:3 * H]
        g_g = act[:, 3 * H:4 * H]
        c_new = f_g * c + i_g * g_g
        h_new = o_g * jnp.tanh(c_new)
        return h_new, c_new

    zero = jnp.zeros((B, H), jnp.float32)
    h = [zero] * num_layers
    c = [zero] * num_layers

    # T is small and static: fully unrolled in-kernel time loop (equivalent to
    # lax.fori_loop(..., unroll=True)); the strictly serial recurrence stays
    # inside one kernel, nothing touches HBM until the very end.
    for t in range(T):
        g0 = pre0[:, t, :] + jnp.dot(h[0], whs[0],
                                     preferred_element_type=jnp.float32)
        h[0], c[0] = gates_to_state(g0, c[0])
        for l in range(1, num_layers):
            gl = (jnp.dot(h[l - 1], wxs[l], preferred_element_type=jnp.float32)
                  + jnp.dot(h[l], whs[l], preferred_element_type=jnp.float32)
                  + bs[l])
            h[l], c[l] = gates_to_state(gl, c[l])

    # out = tanh(h_last) @ W_fc + b_fc  — single (B, O) store to HBM.
    o_ref[...] = (jnp.dot(jnp.tanh(h[-1]), wfc_ref[...],
                          preferred_element_type=jnp.float32) + bfc_ref[...])


# ----------------------------------------------------------------------------
# Wrapper: one pallas_call, no grid, everything in VMEM
# ----------------------------------------------------------------------------
def lstm_model_forward(x_btf, pparams):
    """x_btf: (B, T, input_size) batch_first. Returns (B, input_size)."""
    layers = pparams["layers"]
    wfc_t = pparams["fc_w_t"]
    bfc = pparams["fc_b"]
    B, T, I = x_btf.shape
    O = wfc_t.shape[1]

    flat = []
    for (wx, wh, b) in layers:
        flat += [wx, wh, b]
    n_in = 1 + len(flat) + 2

    return pl.pallas_call(
        fused_forward_kernel,
        out_shape=jax.ShapeDtypeStruct((B, O), jnp.float32),
        in_specs=[pl.BlockSpec(memory_space=pltpu.MemorySpace.VMEM)] * n_in,
        out_specs=pl.BlockSpec(memory_space=pltpu.MemorySpace.VMEM),
    )(x_btf, *flat, wfc_t, bfc)


# ----------------------------------------------------------------------------
# Parameters: raw (PyTorch layout, gate order i,f,g,o) + Pallas-prepped layout
# ----------------------------------------------------------------------------
def make_params(key, input_size, hidden_size, num_layers):
    """Raw params matching nn.LSTM / nn.Linear shapes and gate order [i,f,g,o]."""
    layers = []
    scale = 1.0 / jnp.sqrt(hidden_size)
    for layer in range(num_layers):
        in_dim = input_size if layer == 0 else hidden_size
        key, k1, k2, k3, k4 = jax.random.split(key, 5)
        w_ih = jax.random.uniform(k1, (4 * hidden_size, in_dim), jnp.float32, -scale, scale)
        w_hh = jax.random.uniform(k2, (4 * hidden_size, hidden_size), jnp.float32, -scale, scale)
        b_ih = jax.random.uniform(k3, (4 * hidden_size,), jnp.float32, -scale, scale)
        b_hh = jax.random.uniform(k4, (4 * hidden_size,), jnp.float32, -scale, scale)
        layers.append((w_ih, w_hh, b_ih, b_hh))
    key, k5, k6 = jax.random.split(key, 3)
    w_fc = jax.random.uniform(k5, (input_size, hidden_size), jnp.float32, -scale, scale)
    b_fc = jax.random.uniform(k6, (input_size,), jnp.float32, -scale, scale)
    return {"layers": layers, "fc_w": w_fc, "fc_b": b_fc}


def _reorder_gates(rows_4h):
    """PyTorch gate-row order [i, f, g, o] -> kernel order [i, f, o, g]."""
    i, f, g, o = jnp.split(rows_4h, 4, axis=0)
    return jnp.concatenate([i, f, o, g], axis=0)


def prepare_pallas_params(raw):
    layers = []
    for (w_ih, w_hh, b_ih, b_hh) in raw["layers"]:
        wx = jnp.transpose(_reorder_gates(w_ih))                  # (in, 4H)
        wh = jnp.transpose(_reorder_gates(w_hh))                  # (H, 4H)
        b = jnp.transpose(_reorder_gates((b_ih + b_hh)[:, None])) # (1, 4H)
        layers.append((wx, wh, b))
    return {"layers": layers,
            "fc_w_t": jnp.transpose(raw["fc_w"]),                 # (H, O)
            "fc_b": raw["fc_b"][None, :]}                         # (1, O)


# ----------------------------------------------------------------------------
# Pure-JAX reference (standard PyTorch gate order), for correctness check
# ----------------------------------------------------------------------------
def lstm_model_reference(x_btf, raw):
    x = jnp.transpose(x_btf, (1, 0, 2))          # (T, B, I) time-major
    for (w_ih, w_hh, b_ih, b_hh) in raw["layers"]:
        H = w_hh.shape[1]
        wih_t, whh_t, b = w_ih.T, w_hh.T, (b_ih + b_hh)

        def step(carry, x_t):
            h, c = carry
            gates = x_t @ wih_t + h @ whh_t + b
            i = jax.nn.sigmoid(gates[:, 0 * H:1 * H])
            f = jax.nn.sigmoid(gates[:, 1 * H:2 * H])
            g = jnp.tanh(gates[:, 2 * H:3 * H])
            o = jax.nn.sigmoid(gates[:, 3 * H:4 * H])
            c = f * c + i * g
            h = o * jnp.tanh(c)
            return (h, c), h

        B = x.shape[1]
        init = (jnp.zeros((B, H), jnp.float32), jnp.zeros((B, H), jnp.float32))
        _, x = jax.lax.scan(step, init, x)
    h_last = x[-1]
    return jnp.tanh(h_last) @ raw["fc_w"].T + raw["fc_b"]


# ----------------------------------------------------------------------------
if __name__ == "__main__":
    INPUT_SIZE = 16
    HIDDEN_SIZE = 32     # 4H = 128 -> gate matmul N dim exactly fills the lane width
    NUM_LAYERS = 2
    BATCH = 2            # NOTE: B=2 leaves the MXU mostly idle; batch more seqs if possible
    SEQ = 8

    key = jax.random.PRNGKey(0)
    key, kx = jax.random.split(key)
    x = jax.random.normal(kx, (BATCH, SEQ, INPUT_SIZE), jnp.float32)  # batch_first

    raw_params = make_params(key, INPUT_SIZE, HIDDEN_SIZE, NUM_LAYERS)
    pallas_params = prepare_pallas_params(raw_params)

    out = lstm_model_forward(x, pallas_params)
    out = jax.block_until_ready(out)

    ref = lstm_model_reference(x, raw_params)
    assert out.shape == (BATCH, INPUT_SIZE)
    assert jnp.allclose(out, ref, atol=1e-4, rtol=1e-4), "mismatch vs reference"

    print("KERNEL_OK")
</pallas_src>

<mosaic_0001>
module attributes {stable_mosaic.version = 11 : i64} {
  func.func @fused_forward_kernel(%arg0: memref<2x8x16xf32, #tpu.memory_space<vmem>>, %arg1: memref<16x128xf32, #tpu.memory_space<vmem>>, %arg2: memref<32x128xf32, #tpu.memory_space<vmem>>, %arg3: memref<1x128xf32, #tpu.memory_space<vmem>>, %arg4: memref<32x128xf32, #tpu.memory_space<vmem>>, %arg5: memref<32x128xf32, #tpu.memory_space<vmem>>, %arg6: memref<1x128xf32, #tpu.memory_space<vmem>>, %arg7: memref<32x16xf32, #tpu.memory_space<vmem>>, %arg8: memref<1x16xf32, #tpu.memory_space<vmem>>, %arg9: memref<2x16xf32, #tpu.memory_space<vmem>>) attributes {dimension_semantics = [], scalar_prefetch = 0 : i64, scratch_operands = 0 : i64, tpu.core_type = #tpu.core_type<tc>} {
    %c0 = arith.constant 0 : index
    %c0_0 = arith.constant 0 : index
    %c0_1 = arith.constant 0 : index
    %0 = vector.load %arg0[%c0, %c0_0, %c0_1] : memref<2x8x16xf32, #tpu.memory_space<vmem>>, vector<2x8x16xf32>
    %1 = vector.shape_cast %0 : vector<2x8x16xf32> to vector<16x16xf32>
    %c0_2 = arith.constant 0 : index
    %c0_3 = arith.constant 0 : index
    %2 = vector.load %arg1[%c0_2, %c0_3] : memref<16x128xf32, #tpu.memory_space<vmem>>, vector<16x128xf32>
    %cst = arith.constant dense<0.000000e+00> : vector<16x128xf32>
    %3 = tpu.matmul %1, %2, %cst {dimension_numbers = #tpu.dot_dimension_numbers<[1], [0], [0], [1], [0, 0, 1, 1], [], []>} : vector<16x16xf32>, vector<16x128xf32>, vector<16x128xf32> -> vector<16x128xf32>
    %c0_4 = arith.constant 0 : index
    %c0_5 = arith.constant 0 : index
    %4 = vector.load %arg3[%c0_4, %c0_5] : memref<1x128xf32, #tpu.memory_space<vmem>>, vector<1x128xf32>
    %5 = vector.broadcast %4 : vector<1x128xf32> to vector<16x128xf32>
    %6 = arith.addf %3, %5 : vector<16x128xf32>
    %7 = vector.shape_cast %6 : vector<16x128xf32> to vector<2x8x128xf32>
    %c0_6 = arith.constant 0 : index
    %c0_7 = arith.constant 0 : index
    %8 = vector.load %arg2[%c0_6, %c0_7] : memref<32x128xf32, #tpu.memory_space<vmem>>, vector<32x128xf32>
    %c0_8 = arith.constant 0 : index
    %c0_9 = arith.constant 0 : index
    %9 = vector.load %arg5[%c0_8, %c0_9] : memref<32x128xf32, #tpu.memory_space<vmem>>, vector<32x128xf32>
    %c0_10 = arith.constant 0 : index
    %c0_11 = arith.constant 0 : index
    %10 = vector.load %arg4[%c0_10, %c0_11] : memref<32x128xf32, #tpu.memory_space<vmem>>, vector<32x128xf32>
    %c0_12 = arith.constant 0 : index
    %c0_13 = arith.constant 0 : index
    %11 = vector.load %arg6[%c0_12, %c0_13] : memref<1x128xf32, #tpu.memory_space<vmem>>, vector<1x128xf32>
    %12 = vector.shape_cast %11 : vector<1x128xf32> to vector<1x128xf32>
    %13 = vector.broadcast %12 : vector<1x128xf32> to vector<2x128xf32>
    %14 = tpu.iota {dimensions = array<i32: 1>} : vector<2x128xi32>
    %c96_i32 = arith.constant 96 : i32
    %15 = vector.broadcast %c96_i32 : i32 to vector<2x128xi32>
    %16 = arith.cmpi slt, %14, %15 : vector<2x128xi32>
    %cst_14 = arith.constant 0.000000e+00 : f32
    %17 = vector.broadcast %cst_14 : f32 to vector<2x32xf32>
    %18 = vector.extract_strided_slice %7 {offsets = [0, 0, 0], sizes = [2, 1, 128], strides = [1, 1, 1]} : vector<2x8x128xf32> to vector<2x1x128xf32>
    %19 = vector.shape_cast %18 : vector<2x1x128xf32> to vector<2x128xf32>
    %cst_15 = arith.constant dense<0.000000e+00> : vector<2x128xf32>
    %20 = tpu.matmul %17, %8, %cst_15 {dimension_numbers = #tpu.dot_dimension_numbers<[1], [0], [0], [1], [0, 0, 1, 1], [], []>} : vector<2x32xf32>, vector<32x128xf32>, vector<2x128xf32> -> vector<2x128xf32>
    %21 = arith.addf %19, %20 : vector<2x128xf32>
    %22 = arith.negf %21 : vector<2x128xf32>
    %23 = math.exp %22 : vector<2x128xf32>
    %cst_16 = arith.constant 1.000000e+00 : f32
    %24 = vector.broadcast %cst_16 : f32 to vector<2x128xf32>
    %25 = arith.addf %24, %23 : vector<2x128xf32>
    %26 = arith.divf %24, %25 : vector<2x128xf32>
    %27 = math.tanh %21 : vector<2x128xf32>
    %28 = arith.select %16, %26, %27 : vector<2x128xi1>, vector<2x128xf32>
    %29 = vector.extract_strided_slice %28 {offsets = [0, 0], sizes = [2, 32], strides = [1, 1]} : vector<2x128xf32> to vector<2x32xf32>
    %30 = vector.extract_strided_slice %28 {offsets = [0, 32], sizes = [2, 32], strides = [1, 1]} : vector<2x128xf32> to vector<2x32xf32>
    %31 = vector.extract_strided_slice %28 {offsets = [0, 64], sizes = [2, 32], strides = [1, 1]} : vector<2x128xf32> to vector<2x32xf32>
    %32 = vector.extract_strided_slice %28 {offsets = [0, 96], sizes = [2, 32], strides = [1, 1]} : vector<2x128xf32> to vector<2x32xf32>
    %33 = arith.mulf %30, %17 : vector<2x32xf32>
    %34 = arith.mulf %29, %32 : vector<2x32xf32>
    %35 = arith.addf %33, %34 : vector<2x32xf32>
    %36 = math.tanh %35 : vector<2x32xf32>
    %37 = arith.mulf %31, %36 : vector<2x32xf32>
    %cst_17 = arith.constant dense<0.000000e+00> : vector<2x128xf32>
    %38 = tpu.matmul %37, %10, %cst_17 {dimension_numbers = #tpu.dot_dimension_numbers<[1], [0], [0], [1], [0, 0, 1, 1], [], []>} : vector<2x32xf32>, vector<32x128xf32>, vector<2x128xf32> -> vector<2x128xf32>
    %cst_18 = arith.constant dense<0.000000e+00> : vector<2x128xf32>
    %39 = tpu.matmul %17, %9, %cst_18 {dimension_numbers = #tpu.dot_dimension_numbers<[1], [0], [0], [1], [0, 0, 1, 1], [], []>} : vector<2x32xf32>, vector<32x128xf32>, vector<2x128xf32> -> vector<2x128xf32>
    %40 = arith.addf %38, %39 : vector<2x128xf32>
    %41 = arith.addf %40, %13 : vector<2x128xf32>
    %42 = arith.negf %41 : vector<2x128xf32>
    %43 = math.exp %42 : vector<2x128xf32>
    %cst_19 = arith.constant 1.000000e+00 : f32
    %44 = vector.broadcast %cst_19 : f32 to vector<2x128xf32>
    %45 = arith.addf %44, %43 : vector<2x128xf32>
    %46 = arith.divf %44, %45 : vector<2x128xf32>
    %47 = math.tanh %41 : vector<2x128xf32>
    %48 = arith.select %16, %46, %47 : vector<2x128xi1>, vector<2x128xf32>
    %49 = vector.extract_strided_slice %48 {offsets = [0, 0], sizes = [2, 32], strides = [1, 1]} : vector<2x128xf32> to vector<2x32xf32>
    %50 = vector.extract_strided_slice %48 {offsets = [0, 32], sizes = [2, 32], strides = [1, 1]} : vector<2x128xf32> to vector<2x32xf32>
    %51 = vector.extract_strided_slice %48 {offsets = [0, 64], sizes = [2, 32], strides = [1, 1]} : vector<2x128xf32> to vector<2x32xf32>
    %52 = vector.extract_strided_slice %48 {offsets = [0, 96], sizes = [2, 32], strides = [1, 1]} : vector<2x128xf32> to vector<2x32xf32>
    %53 = arith.mulf %50, %17 : vector<2x32xf32>
    %54 = arith.mulf %49, %52 : vector<2x32xf32>
    %55 = arith.addf %53, %54 : vector<2x32xf32>
    %56 = math.tanh %55 : vector<2x32xf32>
    %57 = arith.mulf %51, %56 : vector<2x32xf32>
    %58 = vector.extract_strided_slice %7 {offsets = [0, 1, 0], sizes = [2, 1, 128], strides = [1, 1, 1]} : vector<2x8x128xf32> to vector<2x1x128xf32>
    %59 = vector.shape_cast %58 : vector<2x1x128xf32> to vector<2x128xf32>
    %cst_20 = arith.constant dense<0.000000e+00> : vector<2x128xf32>
    %60 = tpu.matmul %37, %8, %cst_20 {dimension_numbers = #tpu.dot_dimension_numbers<[1], [0], [0], [1], [0, 0, 1, 1], [], []>} : vector<2x32xf32>, vector<32x128xf32>, vector<2x128xf32> -> vector<2x128xf32>
    %61 = arith.addf %59, %60 : vector<2x128xf32>
    %62 = arith.negf %61 : vector<2x128xf32>
    %63 = math.exp %62 : vector<2x128xf32>
    %cst_21 = arith.constant 1.000000e+00 : f32
    %64 = vector.broadcast %cst_21 : f32 to vector<2x128xf32>
    %65 = arith.addf %64, %63 : vector<2x128xf32>
    %66 = arith.divf %64, %65 : vector<2x128xf32>
    %67 = math.tanh %61 : vector<2x128xf32>
    %68 = arith.select %16, %66, %67 : vector<2x128xi1>, vector<2x128xf32>
    %69 = vector.extract_strided_slice %68 {offsets = [0, 0], sizes = [2, 32], strides = [1, 1]} : vector<2x128xf32> to vector<2x32xf32>
    %70 = vector.extract_strided_slice %68 {offsets = [0, 32], sizes = [2, 32], strides = [1, 1]} : vector<2x128xf32> to vector<2x32xf32>
    %71 = vector.extract_strided_slice %68 {offsets = [0, 64], sizes = [2, 32], strides = [1, 1]} : vector<2x128xf32> to vector<2x32xf32>
    %72 = vector.extract_strided_slice %68 {offsets = [0, 96], sizes = [2, 32], strides = [1, 1]} : vector<2x128xf32> to vector<2x32xf32>
    %73 = arith.mulf %70, %35 : vector<2x32xf32>
    %74 = arith.mulf %69, %72 : vector<2x32xf32>
    %75 = arith.addf %73, %74 : vector<2x32xf32>
    %76 = math.tanh %75 : vector<2x32xf32>
    %77 = arith.mulf %71, %76 : vector<2x32xf32>
    %cst_22 = arith.constant dense<0.000000e+00> : vector<2x128xf32>
    %78 = tpu.matmul %77, %10, %cst_22 {dimension_numbers = #tpu.dot_dimension_numbers<[1], [0], [0], [1], [0, 0, 1, 1], [], []>} : vector<2x32xf32>, vector<32x128xf32>, vector<2x128xf32> -> vector<2x128xf32>
    %cst_23 = arith.constant dense<0.000000e+00> : vector<2x128xf32>
    %79 = tpu.matmul %57, %9, %cst_23 {dimension_numbers = #tpu.dot_dimension_numbers<[1], [0], [0], [1], [0, 0, 1, 1], [], []>} : vector<2x32xf32>, vector<32x128xf32>, vector<2x128xf32> -> vector<2x128xf32>
    %80 = arith.addf %78, %79 : vector<2x128xf32>
    %81 = arith.addf %80, %13 : vector<2x128xf32>
    %82 = arith.negf %81 : vector<2x128xf32>
    %83 = math.exp %82 : vector<2x128xf32>
    %cst_24 = arith.constant 1.000000e+00 : f32
    %84 = vector.broadcast %cst_24 : f32 to vector<2x128xf32>
    %85 = arith.addf %84, %83 : vector<2x128xf32>
    %86 = arith.divf %84, %85 : vector<2x128xf32>
    %87 = math.tanh %81 : vector<2x128xf32>
    %88 = arith.select %16, %86, %87 : vector<2x128xi1>, vector<2x128xf32>
    %89 = vector.extract_strided_slice %88 {offsets = [0, 0], sizes = [2, 32], strides = [1, 1]} : vector<2x128xf32> to vector<2x32xf32>
    %90 = vector.extract_strided_slice %88 {offsets = [0, 32], sizes = [2, 32], strides = [1, 1]} : vector<2x128xf32> to vector<2x32xf32>
    %91 = vector.extract_strided_slice %88 {offsets = [0, 64], sizes = [2, 32], strides = [1, 1]} : vector<2x128xf32> to vector<2x32xf32>
    %92 = vector.extract_strided_slice %88 {offsets = [0, 96], sizes = [2, 32], strides = [1, 1]} : vector<2x128xf32> to vector<2x32xf32>
    %93 = arith.mulf %90, %55 : vector<2x32xf32>
    %94 = arith.mulf %89, %92 : vector<2x32xf32>
    %95 = arith.addf %93, %94 : vector<2x32xf32>
    %96 = math.tanh %95 : vector<2x32xf32>
    %97 = arith.mulf %91, %96 : vector<2x32xf32>
    %98 = vector.extract_strided_slice %7 {offsets = [0, 2, 0], sizes = [2, 1, 128], strides = [1, 1, 1]} : vector<2x8x128xf32> to vector<2x1x128xf32>
    %99 = vector.shape_cast %98 : vector<2x1x128xf32> to vector<2x128xf32>
    %cst_25 = arith.constant dense<0.000000e+00> : vector<2x128xf32>
    %100 = tpu.matmul %77, %8, %cst_25 {dimension_numbers = #tpu.dot_dimension_numbers<[1], [0], [0], [1], [0, 0, 1, 1], [], []>} : vector<2x32xf32>, vector<32x128xf32>, vector<2x128xf32> -> vector<2x128xf32>
    %101 = arith.addf %99, %100 : vector<2x128xf32>
    %102 = arith.negf %101 : vector<2x128xf32>
    %103 = math.exp %102 : vector<2x128xf32>
    %cst_26 = arith.constant 1.000000e+00 : f32
    %104 = vector.broadcast %cst_26 : f32 to vector<2x128xf32>
    %105 = arith.addf %104, %103 : vector<2x128xf32>
    %106 = arith.divf %104, %105 : vector<2x128xf32>
    %107 = math.tanh %101 : vector<2x128xf32>
    %108 = arith.select %16, %106, %107 : vector<2x128xi1>, vector<2x128xf32>
    %109 = vector.extract_strided_slice %108 {offsets = [0, 0], sizes = [2, 32], strides = [1, 1]} : vector<2x128xf32> to vector<2x32xf32>
    %110 = vector.extract_strided_slice %108 {offsets = [0, 32], sizes = [2, 32], strides = [1, 1]} : vector<2x128xf32> to vector<2x32xf32>
    %111 = vector.extract_strided_slice %108 {offsets = [0, 64], sizes = [2, 32], strides = [1, 1]} : vector<2x128xf32> to vector<2x32xf32>
    %112 = vector.extract_strided_slice %108 {offsets = [0, 96], sizes = [2, 32], strides = [1, 1]} : vector<2x128xf32> to vector<2x32xf32>
    %113 = arith.mulf %110, %75 : vector<2x32xf32>
    %114 = arith.mulf %109, %112 : vector<2x32xf32>
    %115 = arith.addf %113, %114 : vector<2x32xf32>
    %116 = math.tanh %115 : vector<2x32xf32>
    %117 = arith.mulf %111, %116 : vector<2x32xf32>
    %cst_27 = arith.constant dense<0.000000e+00> : vector<2x128xf32>
    %118 = tpu.matmul %117, %10, %cst_27 {dimension_numbers = #tpu.dot_dimension_numbers<[1], [0], [0], [1], [0, 0, 1, 1], [], []>} : vector<2x32xf32>, vector<32x128xf32>, vector<2x128xf32> -> vector<2x128xf32>
    %cst_28 = arith.constant dense<0.000000e+00> : vector<2x128xf32>
    %119 = tpu.matmul %97, %9, %cst_28 {dimension_numbers = #tpu.dot_dimension_numbers<[1], [0], [0], [1], [0, 0, 1, 1], [], []>} : vector<2x32xf32>, vector<32x128xf32>, vector<2x128xf32> -> vector<2x128xf32>
    %120 = arith.addf %118, %119 : vector<2x128xf32>
    %121 = arith.addf %120, %13 : vector<2x128xf32>
    %122 = arith.negf %121 : vector<2x128xf32>
    %123 = math.exp %122 : vector<2x128xf32>
    %cst_29 = arith.constant 1.000000e+00 : f32
    %124 = vector.broadcast %cst_29 : f32 to vector<2x128xf32>
    %125 = arith.addf %124, %123 : vector<2x128xf32>
    %126 = arith.divf %124, %125 : vector<2x128xf32>
    %127 = math.tanh %121 : vector<2x128xf32>
    %128 = arith.select %16, %126, %127 : vector<2x128xi1>, vector<2x128xf32>
    %129 = vector.extract_strided_slice %128 {offsets = [0, 0], sizes = [2, 32], strides = [1, 1]} : vector<2x128xf32> to vector<2x32xf32>
    %130 = vector.extract_strided_slice %128 {offsets = [0, 32], sizes = [2, 32], strides = [1, 1]} : vector<2x128xf32> to vector<2x32xf32>
    %131 = vector.extract_strided_slice %128 {offsets = [0, 64], sizes = [2, 32], strides = [1, 1]} : vector<2x128xf32> to vector<2x32xf32>
    %132 = vector.extract_strided_slice %128 {offsets = [0, 96], sizes = [2, 32], strides = [1, 1]} : vector<2x128xf32> to vector<2x32xf32>
    %133 = arith.mulf %130, %95 : vector<2x32xf32>
    %134 = arith.mulf %129, %132 : vector<2x32xf32>
    %135 = arith.addf %133, %134 : vector<2x32xf32>
    %136 = math.tanh %135 : vector<2x32xf32>
    %137 = arith.mulf %131, %136 : vector<2x32xf32>
    %138 = vector.extract_strided_slice %7 {offsets = [0, 3, 0], sizes = [2, 1, 128], strides = [1, 1, 1]} : vector<2x8x128xf32> to vector<2x1x128xf32>
    %139 = vector.shape_cast %138 : vector<2x1x128xf32> to vector<2x128xf32>
    %cst_30 = arith.constant dense<0.000000e+00> : vector<2x128xf32>
    %140 = tpu.matmul %117, %8, %cst_30 {dimension_numbers = #tpu.dot_dimension_numbers<[1], [0], [0], [1], [0, 0, 1, 1], [], []>} : vector<2x32xf32>, vector<32x128xf32>, vector<2x128xf32> -> vector<2x128xf32>
    %141 = arith.addf %139, %140 : vector<2x128xf32>
    %142 = arith.negf %141 : vector<2x128xf32>
    %143 = math.exp %142 : vector<2x128xf32>
    %cst_31 = arith.constant 1.000000e+00 : f32
    %144 = vector.broadcast %cst_31 : f32 to vector<2x128xf32>
    %145 = arith.addf %144, %143 : vector<2x128xf32>
    %146 = arith.divf %144, %145 : vector<2x128xf32>
    %147 = math.tanh %141 : vector<2x128xf32>
    %148 = arith.select %16, %146, %147 : vector<2x128xi1>, vector<2x128xf32>
    %149 = vector.extract_strided_slice %148 {offsets = [0, 0], sizes = [2, 32], strides = [1, 1]} : vector<2x128xf32> to vector<2x32xf32>
    %150 = vector.extract_strided_slice %148 {offsets = [0, 32], sizes = [2, 32], strides = [1, 1]} : vector<2x128xf32> to vector<2x32xf32>
    %151 = vector.extract_strided_slice %148 {offsets = [0, 64], sizes = [2, 32], strides = [1, 1]} : vector<2x128xf32> to vector<2x32xf32>
    %152 = vector.extract_strided_slice %148 {offsets = [0, 96], sizes = [2, 32], strides = [1, 1]} : vector<2x128xf32> to vector<2x32xf32>
    %153 = arith.mulf %150, %115 : vector<2x32xf32>
    %154 = arith.mulf %149, %152 : vector<2x32xf32>
    %155 = arith.addf %153, %154 : vector<2x32xf32>
    %156 = math.tanh %155 : vector<2x32xf32>
    %157 = arith.mulf %151, %156 : vector<2x32xf32>
    %cst_32 = arith.constant dense<0.000000e+00> : vector<2x128xf32>
    %158 = tpu.matmul %157, %10, %cst_32 {dimension_numbers = #tpu.dot_dimension_numbers<[1], [0], [0], [1], [0, 0, 1, 1], [], []>} : vector<2x32xf32>, vector<32x128xf32>, vector<2x128xf32> -> vector<2x128xf32>
    %cst_33 = arith.constant dense<0.000000e+00> : vector<2x128xf32>
    %159 = tpu.matmul %137, %9, %cst_33 {dimension_numbers = #tpu.dot_dimension_numbers<[1], [0], [0], [1], [0, 0, 1, 1], [], []>} : vector<2x32xf32>, vector<32x128xf32>, vector<2x128xf32> -> vector<2x128xf32>
    %160 = arith.addf %158, %159 : vector<2x128xf32>
    %161 = arith.addf %160, %13 : vector<2x128xf32>
    %162 = arith.negf %161 : vector<2x128xf32>
    %163 = math.exp %162 : vector<2x128xf32>
    %cst_34 = arith.constant 1.000000e+00 : f32
    %164 = vector.broadcast %cst_34 : f32 to vector<2x128xf32>
    %165 = arith.addf %164, %163 : vector<2x128xf32>
    %166 = arith.divf %164, %165 : vector<2x128xf32>
    %167 = math.tanh %161 : vector<2x128xf32>
    %168 = arith.select %16, %166, %167 : vector<2x128xi1>, vector<2x128xf32>
    %169 = vector.extract_strided_slice %168 {offsets = [0, 0], sizes = [2, 32], strides = [1, 1]} : vector<2x128xf32> to vector<2x32xf32>
    %170 = vector.extract_strided_slice %168 {offsets = [0, 32], sizes = [2, 32], strides = [1, 1]} : vector<2x128xf32> to vector<2x32xf32>
    %171 = vector.extract_strided_slice %168 {offsets = [0, 64], sizes = [2, 32], strides = [1, 1]} : vector<2x128xf32> to vector<2x32xf32>
    %172 = vector.extract_strided_slice %168 {offsets = [0, 96], sizes = [2, 32], strides = [1, 1]} : vector<2x128xf32> to vector<2x32xf32>
    %173 = arith.mulf %170, %135 : vector<2x32xf32>
    %174 = arith.mulf %169, %172 : vector<2x32xf32>
    %175 = arith.addf %173, %174 : vector<2x32xf32>
    %176 = math.tanh %175 : vector<2x32xf32>
    %177 = arith.mulf %171, %176 : vector<2x32xf32>
    %178 = vector.extract_strided_slice %7 {offsets = [0, 4, 0], sizes = [2, 1, 128], strides = [1, 1, 1]} : vector<2x8x128xf32> to vector<2x1x128xf32>
    %179 = vector.shape_cast %178 : vector<2x1x128xf32> to vector<2x128xf32>
    %cst_35 = arith.constant dense<0.000000e+00> : vector<2x128xf32>
    %180 = tpu.matmul %157, %8, %cst_35 {dimension_numbers = #tpu.dot_dimension_numbers<[1], [0], [0], [1], [0, 0, 1, 1], [], []>} : vector<2x32xf32>, vector<32x128xf32>, vector<2x128xf32> -> vector<2x128xf32>
    %181 = arith.addf %179, %180 : vector<2x128xf32>
    %182 = arith.negf %181 : vector<2x128xf32>
    %183 = math.exp %182 : vector<2x128xf32>
    %cst_36 = arith.constant 1.000000e+00 : f32
    %184 = vector.broadcast %cst_36 : f32 to vector<2x128xf32>
    %185 = arith.addf %184, %183 : vector<2x128xf32>
    %186 = arith.divf %184, %185 : vector<2x128xf32>
    %187 = math.tanh %181 : vector<2x128xf32>
    %188 = arith.select %16, %186, %187 : vector<2x128xi1>, vector<2x128xf32>
    %189 = vector.extract_strided_slice %188 {offsets = [0, 0], sizes = [2, 32], strides = [1, 1]} : vector<2x128xf32> to vector<2x32xf32>
    %190 = vector.extract_strided_slice %188 {offsets = [0, 32], sizes = [2, 32], strides = [1, 1]} : vector<2x128xf32> to vector<2x32xf32>
    %191 = vector.extract_strided_slice %188 {offsets = [0, 64], sizes = [2, 32], strides = [1, 1]} : vector<2x128xf32> to vector<2x32xf32>
    %192 = vector.extract_strided_slice %188 {offsets = [0, 96], sizes = [2, 32], strides = [1, 1]} : vector<2x128xf32> to vector<2x32xf32>
    %193 = arith.mulf %190, %155 : vector<2x32xf32>
    %194 = arith.mulf %189, %192 : vector<2x32xf32>
    %195 = arith.addf %193, %194 : vector<2x32xf32>
    %196 = math.tanh %195 : vector<2x32xf32>
    %197 = arith.mulf %191, %196 : vector<2x32xf32>
    %cst_37 = arith.constant dense<0.000000e+00> : vector<2x128xf32>
    %198 = tpu.matmul %197, %10, %cst_37 {dimension_numbers = #tpu.dot_dimension_numbers<[1], [0], [0], [1], [0, 0, 1, 1], [], []>} : vector<2x32xf32>, vector<32x128xf32>, vector<2x128xf32> -> vector<2x128xf32>
    %cst_38 = arith.constant dense<0.000000e+00> : vector<2x128xf32>
    %199 = tpu.matmul %177, %9, %cst_38 {dimension_numbers = #tpu.dot_dimension_numbers<[1], [0], [0], [1], [0, 0, 1, 1], [], []>} : vector<2x32xf32>, vector<32x128xf32>, vector<2x128xf32> -> vector<2x128xf32>
    %200 = arith.addf %198, %199 : vector<2x128xf32>
    %201 = arith.addf %200, %13 : vector<2x128xf32>
    %202 = arith.negf %201 : vector<2x128xf32>
    %203 = math.exp %202 : vector<2x128xf32>
    %cst_39 = arith.constant 1.000000e+00 : f32
    %204 = vector.broadcast %cst_39 : f32 to vector<2x128xf32>
    %205 = arith.addf %204, %203 : vector<2x128xf32>
    %206 = arith.divf %204, %205 : vector<2x128xf32>
    %207 = math.tanh %201 : vector<2x128xf32>
    %208 = arith.select %16, %206, %207 : vector<2x128xi1>, vector<2x128xf32>
    %209 = vector.extract_strided_slice %208 {offsets = [0, 0], sizes = [2, 32], strides = [1, 1]} : vector<2x128xf32> to vector<2x32xf32>
    %210 = vector.extract_strided_slice %208 {offsets = [0, 32], sizes = [2, 32], strides = [1, 1]} : vector<2x128xf32> to vector<2x32xf32>
    %211 = vector.extract_strided_slice %208 {offsets = [0, 64], sizes = [2, 32], strides = [1, 1]} : vector<2x128xf32> to vector<2x32xf32>
    %212 = vector.extract_strided_slice %208 {offsets = [0, 96], sizes = [2, 32], strides = [1, 1]} : vector<2x128xf32> to vector<2x32xf32>
    %213 = arith.mulf %210, %175 : vector<2x32xf32>
    %214 = arith.mulf %209, %212 : vector<2x32xf32>
    %215 = arith.addf %213, %214 : vector<2x32xf32>
    %216 = math.tanh %215 : vector<2x32xf32>
    %217 = arith.mulf %211, %216 : vector<2x32xf32>
    %218 = vector.extract_strided_slice %7 {offsets = [0, 5, 0], sizes = [2, 1, 128], strides = [1, 1, 1]} : vector<2x8x128xf32> to vector<2x1x128xf32>
    %219 = vector.shape_cast %218 : vector<2x1x128xf32> to vector<2x128xf32>
    %cst_40 = arith.constant dense<0.000000e+00> : vector<2x128xf32>
    %220 = tpu.matmul %197, %8, %cst_40 {dimension_numbers = #tpu.dot_dimension_numbers<[1], [0], [0], [1], [0, 0, 1, 1], [], []>} : vector<2x32xf32>, vector<32x128xf32>, vector<2x128xf32> -> vector<2x128xf32>
    %221 = arith.addf %219, %220 : vector<2x128xf32>
    %222 = arith.negf %221 : vector<2x128xf32>
    %223 = math.exp %222 : vector<2x128xf32>
    %cst_41 = arith.constant 1.000000e+00 : f32
    %224 = vector.broadcast %cst_41 : f32 to vector<2x128xf32>
    %225 = arith.addf %224, %223 : vector<2x128xf32>
    %226 = arith.divf %224, %225 : vector<2x128xf32>
    %227 = math.tanh %221 : vector<2x128xf32>
    %228 = arith.select %16, %226, %227 : vector<2x128xi1>, vector<2x128xf32>
    %229 = vector.extract_strided_slice %228 {offsets = [0, 0], sizes = [2, 32], strides = [1, 1]} : vector<2x128xf32> to vector<2x32xf32>
    %230 = vector.extract_strided_slice %228 {offsets = [0, 32], sizes = [2, 32], strides = [1, 1]} : vector<2x128xf32> to vector<2x32xf32>
    %231 = vector.extract_strided_slice %228 {offsets = [0, 64], sizes = [2, 32], strides = [1, 1]} : vector<2x128xf32> to vector<2x32xf32>
    %232 = vector.extract_strided_slice %228 {offsets = [0, 96], sizes = [2, 32], strides = [1, 1]} : vector<2x128xf32> to vector<2x32xf32>
    %233 = arith.mulf %230, %195 : vector<2x32xf32>
    %234 = arith.mulf %229, %232 : vector<2x32xf32>
    %235 = arith.addf %233, %234 : vector<2x32xf32>
    %236 = math.tanh %235 : vector<2x32xf32>
    %237 = arith.mulf %231, %236 : vector<2x32xf32>
    %cst_42 = arith.constant dense<0.000000e+00> : vector<2x128xf32>
    %238 = tpu.matmul %237, %10, %cst_42 {dimension_numbers = #tpu.dot_dimension_numbers<[1], [0], [0], [1], [0, 0, 1, 1], [], []>} : vector<2x32xf32>, vector<32x128xf32>, vector<2x128xf32> -> vector<2x128xf32>
    %cst_43 = arith.constant dense<0.000000e+00> : vector<2x128xf32>
    %239 = tpu.matmul %217, %9, %cst_43 {dimension_numbers = #tpu.dot_dimension_numbers<[1], [0], [0], [1], [0, 0, 1, 1], [], []>} : vector<2x32xf32>, vector<32x128xf32>, vector<2x128xf32> -> vector<2x128xf32>
    %240 = arith.addf %238, %239 : vector<2x128xf32>
    %241 = arith.addf %240, %13 : vector<2x128xf32>
    %242 = arith.negf %241 : vector<2x128xf32>
    %243 = math.exp %242 : vector<2x128xf32>
    %cst_44 = arith.constant 1.000000e+00 : f32
    %244 = vector.broadcast %cst_44 : f32 to vector<2x128xf32>
    %245 = arith.addf %244, %243 : vector<2x128xf32>
    %246 = arith.divf %244, %245 : vector<2x128xf32>
    %247 = math.tanh %241 : vector<2x128xf32>
    %248 = arith.select %16, %246, %247 : vector<2x128xi1>, vector<2x128xf32>
    %249 = vector.extract_strided_slice %248 {offsets = [0, 0], sizes = [2, 32], strides = [1, 1]} : vector<2x128xf32> to vector<2x32xf32>
    %250 = vector.extract_strided_slice %248 {offsets = [0, 32], sizes = [2, 32], strides = [1, 1]} : vector<2x128xf32> to vector<2x32xf32>
    %251 = vector.extract_strided_slice %248 {offsets = [0, 64], sizes = [2, 32], strides = [1, 1]} : vector<2x128xf32> to vector<2x32xf32>
    %252 = vector.extract_strided_slice %248 {offsets = [0, 96], sizes = [2, 32], strides = [1, 1]} : vector<2x128xf32> to vector<2x32xf32>
    %253 = arith.mulf %250, %215 : vector<2x32xf32>
    %254 = arith.mulf %249, %252 : vector<2x32xf32>
    %255 = arith.addf %253, %254 : vector<2x32xf32>
    %256 = math.tanh %255 : vector<2x32xf32>
    %257 = arith.mulf %251, %256 : vector<2x32xf32>
    %258 = vector.extract_strided_slice %7 {offsets = [0, 6, 0], sizes = [2, 1, 128], strides = [1, 1, 1]} : vector<2x8x128xf32> to vector<2x1x128xf32>
    %259 = vector.shape_cast %258 : vector<2x1x128xf32> to vector<2x128xf32>
    %cst_45 = arith.constant dense<0.000000e+00> : vector<2x128xf32>
    %260 = tpu.matmul %237, %8, %cst_45 {dimension_numbers = #tpu.dot_dimension_numbers<[1], [0], [0], [1], [0, 0, 1, 1], [], []>} : vector<2x32xf32>, vector<32x128xf32>, vector<2x128xf32> -> vector<2x128xf32>
    %261 = arith.addf %259, %260 : vector<2x128xf32>
    %262 = arith.negf %261 : vector<2x128xf32>
    %263 = math.exp %262 : vector<2x128xf32>
    %cst_46 = arith.constant 1.000000e+00 : f32
    %264 = vector.broadcast %cst_46 : f32 to vector<2x128xf32>
    %265 = arith.addf %264, %263 : vector<2x128xf32>
    %266 = arith.divf %264, %265 : vector<2x128xf32>
    %267 = math.tanh %261 : vector<2x128xf32>
    %268 = arith.select %16, %266, %267 : vector<2x128xi1>, vector<2x128xf32>
    %269 = vector.extract_strided_slice %268 {offsets = [0, 0], sizes = [2, 32], strides = [1, 1]} : vector<2x128xf32> to vector<2x32xf32>
    %270 = vector.extract_strided_slice %268 {offsets = [0, 32], sizes = [2, 32], strides = [1, 1]} : vector<2x128xf32> to vector<2x32xf32>
    %271 = vector.extract_strided_slice %268 {offsets = [0, 64], sizes = [2, 32], strides = [1, 1]} : vector<2x128xf32> to vector<2x32xf32>
    %272 = vector.extract_strided_slice %268 {offsets = [0, 96], sizes = [2, 32], strides = [1, 1]} : vector<2x128xf32> to vector<2x32xf32>
    %273 = arith.mulf %270, %235 : vector<2x32xf32>
    %274 = arith.mulf %269, %272 : vector<2x32xf32>
    %275 = arith.addf %273, %274 : vector<2x32xf32>
    %276 = math.tanh %275 : vector<2x32xf32>
    %277 = arith.mulf %271, %276 : vector<2x32xf32>
    %cst_47 = arith.constant dense<0.000000e+00> : vector<2x128xf32>
    %278 = tpu.matmul %277, %10, %cst_47 {dimension_numbers = #tpu.dot_dimension_numbers<[1], [0], [0], [1], [0, 0, 1, 1], [], []>} : vector<2x32xf32>, vector<32x128xf32>, vector<2x128xf32> -> vector<2x128xf32>
    %cst_48 = arith.constant dense<0.000000e+00> : vector<2x128xf32>
    %279 = tpu.matmul %257, %9, %cst_48 {dimension_numbers = #tpu.dot_dimension_numbers<[1], [0], [0], [1], [0, 0, 1, 1], [], []>} : vector<2x32xf32>, vector<32x128xf32>, vector<2x128xf32> -> vector<2x128xf32>
    %280 = arith.addf %278, %279 : vector<2x128xf32>
    %281 = arith.addf %280, %13 : vector<2x128xf32>
    %282 = arith.negf %281 : vector<2x128xf32>
    %283 = math.exp %282 : vector<2x128xf32>
    %cst_49 = arith.constant 1.000000e+00 : f32
    %284 = vector.broadcast %cst_49 : f32 to vector<2x128xf32>
    %285 = arith.addf %284, %283 : vector<2x128xf32>
    %286 = arith.divf %284, %285 : vector<2x128xf32>
    %287 = math.tanh %281 : vector<2x128xf32>
    %288 = arith.select %16, %286, %287 : vector<2x128xi1>, vector<2x128xf32>
    %289 = vector.extract_strided_slice %288 {offsets = [0, 0], sizes = [2, 32], strides = [1, 1]} : vector<2x128xf32> to vector<2x32xf32>
    %290 = vector.extract_strided_slice %288 {offsets = [0, 32], sizes = [2, 32], strides = [1, 1]} : vector<2x128xf32> to vector<2x32xf32>
    %291 = vector.extract_strided_slice %288 {offsets = [0, 64], sizes = [2, 32], strides = [1, 1]} : vector<2x128xf32> to vector<2x32xf32>
    %292 = vector.extract_strided_slice %288 {offsets = [0, 96], sizes = [2, 32], strides = [1, 1]} : vector<2x128xf32> to vector<2x32xf32>
    %293 = arith.mulf %290, %255 : vector<2x32xf32>
    %294 = arith.mulf %289, %292 : vector<2x32xf32>
    %295 = arith.addf %293, %294 : vector<2x32xf32>
    %296 = math.tanh %295 : vector<2x32xf32>
    %297 = arith.mulf %291, %296 : vector<2x32xf32>
    %298 = vector.extract_strided_slice %7 {offsets = [0, 7, 0], sizes = [2, 1, 128], strides = [1, 1, 1]} : vector<2x8x128xf32> to vector<2x1x128xf32>
    %299 = vector.shape_cast %298 : vector<2x1x128xf32> to vector<2x128xf32>
    %cst_50 = arith.constant dense<0.000000e+00> : vector<2x128xf32>
    %300 = tpu.matmul %277, %8, %cst_50 {dimension_numbers = #tpu.dot_dimension_numbers<[1], [0], [0], [1], [0, 0, 1, 1], [], []>} : vector<2x32xf32>, vector<32x128xf32>, vector<2x128xf32> -> vector<2x128xf32>
    %301 = arith.addf %299, %300 : vector<2x128xf32>
    %302 = arith.negf %301 : vector<2x128xf32>
    %303 = math.exp %302 : vector<2x128xf32>
    %cst_51 = arith.constant 1.000000e+00 : f32
    %304 = vector.broadcast %cst_51 : f32 to vector<2x128xf32>
    %305 = arith.addf %304, %303 : vector<2x128xf32>
    %306 = arith.divf %304, %305 : vector<2x128xf32>
    %307 = math.tanh %301 : vector<2x128xf32>
    %308 = arith.select %16, %306, %307 : vector<2x128xi1>, vector<2x128xf32>
    %309 = vector.extract_strided_slice %308 {offsets = [0, 0], sizes = [2, 32], strides = [1, 1]} : vector<2x128xf32> to vector<2x32xf32>
    %310 = vector.extract_strided_slice %308 {offsets = [0, 32], sizes = [2, 32], strides = [1, 1]} : vector<2x128xf32> to vector<2x32xf32>
    %311 = vector.extract_strided_slice %308 {offsets = [0, 64], sizes = [2, 32], strides = [1, 1]} : vector<2x128xf32> to vector<2x32xf32>
    %312 = vector.extract_strided_slice %308 {offsets = [0, 96], sizes = [2, 32], strides = [1, 1]} : vector<2x128xf32> to vector<2x32xf32>
    %313 = arith.mulf %310, %275 : vector<2x32xf32>
    %314 = arith.mulf %309, %312 : vector<2x32xf32>
    %315 = arith.addf %313, %314 : vector<2x32xf32>
    %316 = math.tanh %315 : vector<2x32xf32>
    %317 = arith.mulf %311, %316 : vector<2x32xf32>
    %cst_52 = arith.constant dense<0.000000e+00> : vector<2x128xf32>
    %318 = tpu.matmul %317, %10, %cst_52 {dimension_numbers = #tpu.dot_dimension_numbers<[1], [0], [0], [1], [0, 0, 1, 1], [], []>} : vector<2x32xf32>, vector<32x128xf32>, vector<2x128xf32> -> vector<2x128xf32>
    %cst_53 = arith.constant dense<0.000000e+00> : vector<2x128xf32>
    %319 = tpu.matmul %297, %9, %cst_53 {dimension_numbers = #tpu.dot_dimension_numbers<[1], [0], [0], [1], [0, 0, 1, 1], [], []>} : vector<2x32xf32>, vector<32x128xf32>, vector<2x128xf32> -> vector<2x128xf32>
    %320 = arith.addf %318, %319 : vector<2x128xf32>
    %321 = arith.addf %320, %13 : vector<2x128xf32>
    %322 = arith.negf %321 : vector<2x128xf32>
    %323 = math.exp %322 : vector<2x128xf32>
    %cst_54 = arith.constant 1.000000e+00 : f32
    %324 = vector.broadcast %cst_54 : f32 to vector<2x128xf32>
    %325 = arith.addf %324, %323 : vector<2x128xf32>
    %326 = arith.divf %324, %325 : vector<2x128xf32>
    %327 = math.tanh %321 : vector<2x128xf32>
    %328 = arith.select %16, %326, %327 : vector<2x128xi1>, vector<2x128xf32>
    %329 = vector.extract_strided_slice %328 {offsets = [0, 0], sizes = [2, 32], strides = [1, 1]} : vector<2x128xf32> to vector<2x32xf32>
    %330 = vector.extract_strided_slice %328 {offsets = [0, 32], sizes = [2, 32], strides = [1, 1]} : vector<2x128xf32> to vector<2x32xf32>
    %331 = vector.extract_strided_slice %328 {offsets = [0, 64], sizes = [2, 32], strides = [1, 1]} : vector<2x128xf32> to vector<2x32xf32>
    %332 = vector.extract_strided_slice %328 {offsets = [0, 96], sizes = [2, 32], strides = [1, 1]} : vector<2x128xf32> to vector<2x32xf32>
    %333 = arith.mulf %330, %295 : vector<2x32xf32>
    %334 = arith.mulf %329, %332 : vector<2x32xf32>
    %335 = arith.addf %333, %334 : vector<2x32xf32>
    %336 = math.tanh %335 : vector<2x32xf32>
    %337 = arith.mulf %331, %336 : vector<2x32xf32>
    %338 = math.tanh %337 : vector<2x32xf32>
    %c0_55 = arith.constant 0 : index
    %c0_56 = arith.constant 0 : index
    %339 = vector.load %arg7[%c0_55, %c0_56] : memref<32x16xf32, #tpu.memory_space<vmem>>, vector<32x16xf32>
    %cst_57 = arith.constant dense<0.000000e+00> : vector<2x16xf32>
    %340 = tpu.matmul %338, %339, %cst_57 {dimension_numbers = #tpu.dot_dimension_numbers<[1], [0], [0], [1], [0, 0, 1, 1], [], []>} : vector<2x32xf32>, vector<32x16xf32>, vector<2x16xf32> -> vector<2x16xf32>
    %c0_58 = arith.constant 0 : index
    %c0_59 = arith.constant 0 : index
    %341 = vector.load %arg8[%c0_58, %c0_59] : memref<1x16xf32, #tpu.memory_space<vmem>>, vector<1x16xf32>
    %342 = vector.broadcast %341 : vector<1x16xf32> to vector<2x16xf32>
    %343 = arith.addf %340, %342 : vector<2x16xf32>
    %c0_60 = arith.constant 0 : index
    %c0_61 = arith.constant 0 : index
    %344 = vector.load %arg9[%c0_60, %c0_61] : memref<2x16xf32, #tpu.memory_space<vmem>>, vector<2x16xf32>
    tpu.vector_store %arg9[%c0_60, %c0_61], %343 {strides = array<i32>} : memref<2x16xf32, #tpu.memory_space<vmem>>, vector<2x16xf32>,
    return
  }
}

</mosaic_0001>

<bundles_post_ra>
// kernel: tpu_custom_call.1
= control target key start
LH: loop header
LB: loop body
LE: loop exit
PB: predicated region body
PF: predicated region fallthrough
CT: control target
= control target key end

     0   :  { %14 = vsyncpa [#allocation3], 0  ;;  %s4124_s0 = inlined_call_operand.hbm [shape: f32[2,8,16], index: 0, kind: input, shape index: {}]   ;;  %s4125_s1 = inlined_call_operand.hbm [shape: f32[16,128], index: 1, kind: input, shape index: {}]   ;;  %s4126_s2 = inlined_call_operand.vmem [shape: f32[32,128], index: 2, kind: input, shape index: {}]   ;;  %s4127_s3 = inlined_call_operand.vmem [shape: f32[1,128], index: 3, kind: input, shape index: {}]   ;;  %s4128_s4 = inlined_call_operand.hbm [shape: f32[32,128], index: 4, kind: input, shape index: {}]   ;;  %s4129_s5 = inlined_call_operand.vmem [shape: f32[32,128], index: 5, kind: input, shape index: {}]   ;;  %s4130_s6 = inlined_call_operand.vmem [shape: f32[1,128], index: 6, kind: input, shape index: {}]   ;;  %s4131_s7 = inlined_call_operand.vmem [shape: f32[32,16], index: 7, kind: input, shape index: {}]   ;;  %s4132_s8 = inlined_call_operand.vmem [shape: f32[1,16], index: 8, kind: input, shape index: {}]   ;;  %s4133_s9 = inlined_call_operand.hbm [shape: f32[2,16], index: 9, kind: output, shape index: {}]  }
   0x1   :  { %15 = vsyncpa [#allocation6], 0 }
   0x2   :  { %16 = vsyncpa [#allocation4], 0  ;;  %s3565_s30 = smov [#allocation5]   ;;  %s3566_s11 = smov [#allocation2]  }
   0x3   :  { %s34_s10 = sshll.u32 %s3565_s30, 4  ;;  %s22_s12 = sshll.u32 %s3566_s11, 4  ;;  %s35_s10 = int_to_ptr.vmem [resolvable:$true] %s34_s10  ;;  %s3626_s12 = int_to_ptr.vmem [resolvable:$true] %s22_s12 }
   0x4   :  { %s3471_s15 = scalar_lea.hbm %s4125_s1, 256 }
   0x5   :  { %p3472_p0 = scmp.ne.s32.totalorder %s4125_s1, %s3471_s15  ;;  %p3475_p1 = scmp.lt.u32.totalorder %s3471_s15, %s4125_s1 }
   0x7   :  { %p3477_p2 = pnand %p3475_p1, %p3472_p0 }
   0x9   :  { %3480 = shalt.err (!%p3477_p2)
}
   0xa   :  { %s3481_s20 = scalar_lea.vmem %s35_s10, 256  ;;  %p3486_p4 = scmp.lt.s32.totalorder %s35_s10, %s35_s10 }
   0xb   :  { %p3482_p3 = scmp.ne.s32.totalorder %s35_s10, %s3481_s20  ;;  %p3487_p5 = scmp.lt.s32.totalorder %s3481_s20, %s3481_s20 }
   0xd   :  { %p3488_p6 = por %p3487_p5, %p3486_p4 }
   0xf   :  { %p3489_p7 = pnand %p3488_p6, %p3482_p3 }
  0x11   :  { %3492 = shalt.err (!%p3489_p7)
}
  0x12   :  { %s3567_s21 = smov 128   ;;  %s3568_s22 = smov 8  }
  0x13   :  { %40 = dma.hbm_to_vmem [thread:$0]  %s4125_s1, 256, %s35_s10, [#allocation6], %s3567_s21, %s3567_s21, %s3568_s22  }
  0x14   :  { %s3493_s27 = scalar_lea.hbm %s4124_s0, 256 }
  0x15   :  { %p3494_p8 = scmp.ne.s32.totalorder %s4124_s0, %s3493_s27  ;;  %p3497_p9 = scmp.lt.u32.totalorder %s3493_s27, %s4124_s0 }
  0x17   :  { %p3499_p10 = pnand %p3497_p9, %p3494_p8 }
  0x19   :  { %3502 = shalt.err (!%p3499_p10)
}
  0x1a   :  { %s3503_s13 = scalar_lea.vmem %s3626_s12, 256  ;;  %p3508_p12 = scmp.lt.s32.totalorder %s3626_s12, %s3626_s12 }
  0x1b   :  { %p3504_p11 = scmp.ne.s32.totalorder %s3626_s12, %s3503_s13  ;;  %p3509_p13 = scmp.lt.s32.totalorder %s3503_s13, %s3503_s13 }
  0x1d   :  { %p3510_p0 = por %p3509_p13, %p3508_p12 }
  0x1f   :  { %p3511_p1 = pnand %p3510_p0, %p3504_p11 }
  0x21   :  { %3514 = shalt.err (!%p3511_p1)
}
  0x22   :  { %28 = dma.hbm_to_vmem [thread:$0]  %s4124_s0, 256, %s3626_s12, [#allocation3], %s3567_s21, %s3567_s21, %s3568_s22  }
  0x23   :  { %s3569_s14 = smov [#allocation7]   ;;  %s3515_s18 = scalar_lea.hbm %s4128_s4, 512 }
  0x24   :  { %s50_s15 = sshll.u32 %s3569_s14, 4  ;;  %p3516_p2 = scmp.ne.s32.totalorder %s4128_s4, %s3515_s18  ;;  %s51_s15 = int_to_ptr.vmem [resolvable:$true] %s50_s15 }
  0x25   :  { %p3519_p3 = scmp.lt.u32.totalorder %s3515_s18, %s4128_s4 }
  0x27   :  { %p3521_p4 = pnand %p3519_p3, %p3516_p2 }
  0x29   :  { %3524 = shalt.err (!%p3521_p4)
}
  0x2a   :  { %s3525_s25 = scalar_lea.vmem %s51_s15, 512  ;;  %p3530_p6 = scmp.lt.s32.totalorder %s51_s15, %s51_s15 }
  0x2b   :  { %p3526_p5 = scmp.ne.s32.totalorder %s51_s15, %s3525_s25  ;;  %p3531_p7 = scmp.lt.s32.totalorder %s3525_s25, %s3525_s25 }
  0x2d   :  { %p3532_p8 = por %p3531_p7, %p3530_p6 }
  0x2f   :  { %p3533_p9 = pnand %p3532_p8, %p3526_p5 }
  0x31   :  { %3536 = shalt.err (!%p3533_p9)
}
  0x32   :  { %56 = dma.hbm_to_vmem [thread:$0]  %s4128_s4, 512, %s51_s15, [#allocation6], %s3567_s21, %s3567_s21, %s3568_s22  }
  0x33   :  { %3559 = dma.done.wait [#allocation3], 256  }
  0x34   :  { %3560 = vsyncadd [#allocation3], 4294967040 }
  0x35   :  { %3561 = dma.done.wait [#allocation6], 768  }
  0x36   :  { %3562 = vsyncadd [#allocation6], 4294966528  ;;  %v3570_v0 = vmov 0.0|0.0   ;;  %vm3571_vm0 = vmmov 0   ;;  %v3572_v1 = vmov 0.0   ;;  %vm85_vm1 = vcmask 130048  }
  0x37   :  { %3131 = vmatprep.subr.bf16.mxu1 %v3570_v0  ;;  %2860 = vmatprep.mubr.msk.f32.mxu1 %vm3571_vm0, %v3572_v1  ;;  %v76_v2 = vld [vmem:[#allocation5] sm:$0xff]  ;;  %v77_v3 = vld [vmem:[#allocation5 + $0x8] sm:$0xff]  ;;  %v167_v4 = vld [vmem:[%s4126_s2] sm:$0xff]  ;;  %v186_v29 = vlaneseq  ;;  %vm286_vm2 = vcmask 1041409   ;;  %vm189_vm4 = vcmask 261120   ;;  %s3575_s29 = smov [#allocation8]  }
  0x38   :  { %v3127_v5 = vpack.c.bf16 %v77_v3, %v76_v2  ;;  %v168_v6 = vld [vmem:[%s4126_s2 + $0x8] sm:$0xff]  ;;  %v74_v7 = vld [vmem:[#allocation2] sm:$0xff]  ;;  %v169_v9 = vld [vmem:[%s4126_s2 + $0x10] sm:$0xff]  ;;  %vm2646_vm5 = vcmask 123904  }
  0x39   :  { %v3687_v8 = vpack.c.bf16 %v168_v6, %v167_v4  ;;  %2849 = vmatprep.mubr.msk.f32.mxu0 %vm85_vm1, %v74_v7  ;;  %v170_v10 = vld [vmem:[%s4126_s2 + $0x18] sm:$0xff]  ;;  %v75_v11 = vld [vmem:[#allocation2 + $0x8] sm:$0xff]  ;;  %v2664_v13 = vld [vmem:[%s4127_s3] ss:$0 sm:$0xff]  ;;  %v3718_v31 = vand.u32 127, %v186_v29  ;;  %s3573_s3 = smov 32  }
  0x3a   :  { %3128 = vmatprep.subr.bf16.mxu0 %v3127_v5  ;;  %v3697_v12 = vpack.c.bf16 %v170_v10, %v169_v9  ;;  %v171_v45 = vld [vmem:[%s4129_s5] sm:$0xff]  ;;  %v172_v46 = vld [vmem:[%s4129_s5 + $0x8] sm:$0xff]  ;;  %v173_v47 = vld [vmem:[%s4129_s5 + $0x10] sm:$0xff] }
  0x3b   :  { %3133 = vmatpush3.bf16.msra.mxu1 %v3687_v8  ;;  %3130 = vmatpush3.bf16.msra.mxu0 %v3127_v5  ;;  %vm188_vm3 = vcmp.lt.s32.totalorder %v3718_v31, 96  ;;  %v3739_v48 = vpack.c.bf16 %v172_v46, %v171_v45  ;;  %v174_v49 = vld [vmem:[%s4129_s5 + $0x18] sm:$0xff]  ;;  %v175_v50 = vld [vmem:[#allocation7] sm:$0xff]  ;;  %v176_v51 = vld [vmem:[#allocation7 + $0x8] sm:$0xff]  ;;  %s3574_s5 = smov 64  }
  0x3c   :  { %3134 = vmatprep.subr.bf16.mxu1 %v3570_v0  ;;  %3137 = vmatprep.subr.bf16.mxu0 %v3570_v0  ;;  %v3744_v52 = vpack.c.bf16 %v176_v51, %v175_v50  ;;  %v177_v53 = vld [vmem:[#allocation7 + $0x10] sm:$0xff]  ;;  %v178_v54 = vld [vmem:[#allocation7 + $0x18] sm:$0xff]  ;;  %v3747_v55 = vpack.c.bf16 %v174_v49, %v173_v47  ;;  %v3784_v63 = vld [vmem:[%s4130_s6] ss:$0 sm:$0xff] }
  0x3d   :  { %v3751_v56 = vpack.c.bf16 %v178_v54, %v177_v53  ;;  %v2561_v31 = vld [vmem:[%s4131_s7 + $0x8] sm:$0xff] }
  0x3e   :  { %2850 = vmatmul.mubr.msk.f32.vlgmr.msra.gmra.mrb[0].mxu0 %vm85_vm1, %v75_v11 }
  0x3f   :  { %3136 = vmatpush3.bf16.msra.mxu1 %v3697_v12  ;;  %2871 = vmatprep.mubr.msk.f32.mxu0 %vm3571_vm0, %v3572_v1 }
  0x40   :  { %3143 = vmatprep.subr.bf16.mxu1 %v3570_v0  ;;  %3139 = vmatpush3.bf16.msra.mxu0 %v3739_v48 }
  0x41   :  { %3140 = vmatprep.subr.bf16.mxu0 %v3570_v0 }
  0x42   :  { %2861 = vmatmul.mubr.f32.vlgmr.msra.gmra.mrb[0].mxu1 %v3572_v1 }
  0x43   :  { %2882 = vmatprep.mubr.msk.f32.mxu1 %vm3571_vm0, %v3572_v1  ;;  %3145 = vmatpush3.bf16.msra.mxu1 %v3744_v52 }
  0x44   :  { %3146 = vmatprep.subr.bf16.mxu1 %v3570_v0  ;;  %3142 = vmatpush3.bf16.msra.mxu0 %v3747_v55 }
  0x45   :  { %3149 = vmatprep.subr.bf16.mxu0 %v3570_v0 }
  0x47   :  { %3148 = vmatpush3.bf16.msra.mxu1 %v3751_v56  ;;  %2872 = vmatmul.mubr.f32.vlgmr.msra.gmra.mrb[2].mxu0 %v3572_v1 }
  0x48   :  { %3155 = vmatprep.subr.bf16.mxu1 %v3570_v0  ;;  %3151 = vmatpush3.bf16.msra.mxu0 %v3687_v8 }
  0x49   :  { %3152 = vmatprep.subr.bf16.mxu0 %v3570_v0  ;;  %2893 = vmatprep.mubr.msk.f32.mxu0 %vm3571_vm0, %v3572_v1 }
  0x4c   :  { %3154 = vmatpush3.bf16.msra.mxu0 %v3697_v12 }
  0x4d   :  { %3161 = vmatprep.subr.bf16.mxu0 %v3570_v0 }
 0x111   :  { %v2851_v14 = vpop.f32.mrb[0].mxu0 }
 0x112   :  { %v158_v15 = vpop.f32.mrb[1].mxu0  ;;  %v3714_v17 = vadd.f32 %v2851_v14, %v2664_v13 }
 0x113   :  { %v3712_v16 = vadd.f32 %v2664_v13, %v158_v15 }
 0x115   :  { %v259_v18 = vpop.f32.mrb[0].mxu1 }
 0x116   :  { %v264_v19 = vrot.slane %v259_v18, 1  ;;  %v267_v20 = vadd.f32 %v259_v18, %v3712_v16  ;;  %v2862_v21 = vpop.f32.mrb[1].mxu1 }
 0x118   :  { %v268_v22 = vadd.f32 %v264_v19, %v3714_v17  ;;  %v2668_v23 = vmul.f32 -1.442695, %v267_v20 }
 0x11a   :  { %3292 = vpow2.f32 %v2668_v23  ;;  %v2669_v24 = vmul.f32 -1.442695, %v268_v22  ;;  %v378_v60 = vpop.f32.mrb[2].mxu0 }
 0x11b   :  { %v2873_v61 = vpop.f32.mrb[3].mxu0 }
 0x11c   :  { %3294 = vpow2.f32 %v2669_v24 }
 0x11d   :  { %3296 = vtanh.f32 %v268_v22 }
 0x124   :  { %v3293_v25 = vpop.eup %3292 }
 0x125   :  { %v275_v27 = vadd.f32 1.0, %v3293_v25 }
 0x126   :  { %v3295_v26 = vpop.eup %3294 }
 0x127   :  { %v276_v28 = vadd.f32 1.0, %v3295_v26  ;;  %v3297_v30 = vpop.eup %3296 }
 0x128   :  { %v291_v32 = vrot.slane %v3297_v30, 7 }
 0x129   :  { %3298 = vrcp.f32 %v276_v28 }
 0x12a   :  { %3300 = vtanh.f32 %v267_v20 }
 0x12b   :  { %3302 = vrcp.f32 %v275_v27 }
 0x133   :  { %v3299_v33 = vpop.eup %3298 }
 0x134   :  { %v3301_v34 = vpop.eup %3300  ;;  %v285_v35 = vrot.slane %v3299_v33, 7 }
 0x135   :  { %v3303_v36 = vpop.eup %3302  ;;  %v292_v38 = vsel %vm286_vm2, %v291_v32, %v3301_v34 }
 0x136   :  { %v287_v37 = vsel %vm286_vm2, %v285_v35, %v3303_v36 }
 0x137   :  { %v294_v39 = vsel %vm188_vm3, %v287_v37, %v292_v38 }
 0x138   :  { %297 = vrot.lane.b32.xlu0 %v294_v39, %s3573_s3  ;;  %v295_v42 = vmul.f32 0.0, %v294_v39 }
 0x1aa   :  { %v298_v40 = vpop.permute.xlu0 %297 }
 0x1ab   :  { %v300_v41 = vmul.f32 %v298_v40, %v294_v39 }
 0x1ad   :  { %302 = vrot.lane.b32.xlu0 %v300_v41, %s3573_s3 }
 0x21f   :  { %v303_v43 = vpop.permute.xlu0 %302 }
 0x220   :  { %v3727_v44 = vadd.f32 %v303_v43, %v295_v42 }
 0x222   :  { %3304 = vtanh.f32 %v3727_v44 }
 0x22c   :  { %v3305_v57 = vpop.eup %3304 }
 0x22d   :  { %308 = vrot.lane.b32.xlu1 %v3305_v57, %s3573_s3 }
 0x29f   :  { %v309_v58 = vpop.permute.xlu1 %308 }
 0x2a0   :  { %v311_v59 = vmul.f32 %v309_v58, %v294_v39 }
 0x2a2   :  { %383 = vrot.lane.b32.xlu1 %v311_v59, %s3574_s5 }
 0x314   :  { %v384_v62 = vpop.permute.xlu1 %383 }
 0x315   :  { %2883 = vmatmul.mubr.msk.f32.vlgmr.msra.gmra.mrb[2].mxu1 %vm189_vm4, %v384_v62  ;;  %2894 = vmatmul.mubr.msk.f32.vlgmr.msra.gmra.mrb[4].mxu0 %vm189_vm4, %v384_v62 }
 0x316   :  { %3157 = vmatpush3.bf16.msra.mxu1 %v3739_v48  ;;  %3163 = vmatpush3.bf16.msra.mxu0 %v3744_v52 }
 0x317   :  { %3158 = vmatprep.subr.bf16.mxu1 %v3570_v0  ;;  %2904 = vmatprep.mubr.msk.f32.mxu1 %vm3571_vm0, %v3572_v1 }
 0x318   :  { %3164 = vmatprep.subr.bf16.mxu0 %v3570_v0  ;;  %2915 = vmatprep.mubr.msk.f32.mxu0 %vm3571_vm0, %v3572_v1 }
 0x31a   :  { %3160 = vmatpush3.bf16.msra.mxu1 %v3747_v55  ;;  %3166 = vmatpush3.bf16.msra.mxu0 %v3751_v56 }
 0x31b   :  { %3167 = vmatprep.subr.bf16.mxu1 %v3570_v0  ;;  %3173 = vmatprep.subr.bf16.mxu0 %v3570_v0 }
 0x3e8   :  { %v453_v2 = vpop.f32.mrb[2].mxu1  ;;  %v549_v3 = vpop.f32.mrb[4].mxu0 }
 0x3e9   :  { %v454_v4 = vadd.f32 %v453_v2, %v378_v60  ;;  %v554_v5 = vrot.slane %v549_v3, 7  ;;  %v558_v6 = vadd.f32 %v549_v3, %v3714_v17  ;;  %v2884_v7 = vpop.f32.mrb[3].mxu1  ;;  %v2895_v9 = vpop.f32.mrb[5].mxu0 }
 0x3eb   :  { %v457_v10 = vadd.f32 %v3784_v63, %v454_v4  ;;  %v557_v11 = vadd.f32 %v554_v5, %v3712_v16  ;;  %v2674_v13 = vmul.f32 -1.442695, %v558_v6 }
 0x3ed   :  { %v2671_v14 = vmul.f32 -1.442695, %v457_v10  ;;  %v2673_v15 = vmul.f32 -1.442695, %v557_v11  ;;  %3306 = vpow2.f32 %v2674_v13 }
 0x3ef   :  { %3308 = vpow2.f32 %v2671_v14 }
 0x3f0   :  { %3310 = vpow2.f32 %v2673_v15 }
 0x3f1   :  { %3312 = vtanh.f32 %v557_v11 }
 0x3f2   :  { %3314 = vtanh.f32 %v457_v10 }
 0x3f7   :  { %v3307_v18 = vpop.eup %3306 }
 0x3f8   :  { %v566_v23 = vadd.f32 1.0, %v3307_v18 }
 0x3f9   :  { %v3309_v19 = vpop.eup %3308 }
 0x3fa   :  { %v3311_v20 = vpop.eup %3310  ;;  %v461_v21 = vadd.f32 1.0, %v3309_v19 }
 0x3fb   :  { %v565_v22 = vadd.f32 1.0, %v3311_v20  ;;  %v3313_v24 = vpop.eup %3312 }
 0x3fc   :  { %3316 = vrcp.f32 %v461_v21  ;;  %v3315_v25 = vpop.eup %3314  ;;  %v580_v27 = vrot.slane %v3313_v24, 1 }
 0x3fd   :  { %3318 = vrcp.f32 %v565_v22 }
 0x3fe   :  { %3320 = vtanh.f32 %v558_v6 }
 0x3ff   :  { %3322 = vrcp.f32 %v566_v23 }
 0x406   :  { %v3317_v26 = vpop.eup %3316 }
 0x407   :  { %v3319_v28 = vpop.eup %3318  ;;  %v465_v29 = vsel %vm188_vm3, %v3317_v26, %v3315_v25 }
 0x408   :  { %v3321_v30 = vpop.eup %3320  ;;  %468 = vrot.lane.b32.xlu0 %v465_v29, %s3573_s3  ;;  %v575_v32 = vrot.slane %v3319_v28, 1  ;;  %v466_v41 = vmul.f32 0.0, %v465_v29 }
 0x409   :  { %v3323_v33 = vpop.eup %3322  ;;  %v581_v35 = vsel %vm286_vm2, %v3321_v30, %v580_v27 }
 0x40a   :  { %v576_v34 = vsel %vm286_vm2, %v3323_v33, %v575_v32 }
 0x40b   :  { %v583_v36 = vsel %vm188_vm3, %v576_v34, %v581_v35 }
 0x40c   :  { %586 = vrot.lane.b32.xlu1 %v583_v36, %s3573_s3  ;;  %v584_v45 = vmul.f32 %v583_v36, %v3727_v44 }
 0x47a   :  { %v469_v37 = vpop.permute.xlu0 %468 }
 0x47b   :  { %v471_v38 = vmul.f32 %v469_v37, %v465_v29 }
 0x47d   :  { %473 = vrot.lane.b32.xlu0 %v471_v38, %s3573_s3 }
 0x47e   :  { %v587_v39 = vpop.permute.xlu1 %586 }
 0x47f   :  { %v589_v40 = vmul.f32 %v587_v39, %v583_v36 }
 0x481   :  { %591 = vrot.lane.b32.xlu1 %v589_v40, %s3573_s3 }
 0x4ef   :  { %v474_v42 = vpop.permute.xlu0 %473 }
 0x4f0   :  { %v3799_v43 = vadd.f32 %v474_v42, %v466_v41 }
 0x4f2   :  { %3324 = vtanh.f32 %v3799_v43 }
 0x4f3   :  { %v592_v46 = vpop.permute.xlu1 %591 }
 0x4f4   :  { %v3803_v47 = vadd.f32 %v592_v46, %v584_v45 }
 0x4f6   :  { %3326 = vtanh.f32 %v3803_v47 }
 0x4fc   :  { %v3325_v49 = vpop.eup %3324 }
 0x4fd   :  { %479 = vrot.lane.b32.xlu0 %v3325_v49, %s3573_s3 }
 0x500   :  { %v3327_v50 = vpop.eup %3326 }
 0x501   :  { %597 = vrot.lane.b32.xlu1 %v3327_v50, %s3573_s3 }
 0x56f   :  { %v480_v51 = vpop.permute.xlu0 %479 }
 0x570   :  { %v482_v53 = vmul.f32 %v480_v51, %v465_v29 }
 0x572   :  { %602 = vrot.lane.b32.xlu0 %v482_v53, %s3574_s5 }
 0x573   :  { %v598_v54 = vpop.permute.xlu1 %597 }
 0x574   :  { %v600_v57 = vmul.f32 %v598_v54, %v583_v36 }
 0x576   :  { %677 = vrot.lane.b32.xlu1 %v600_v57, %s3574_s5 }
 0x5e4   :  { %v603_v44 = vpop.permute.xlu0 %602 }
 0x5e5   :  { %2905 = vmatmul.mubr.msk.f32.vlgmr.msra.gmra.mrb[4].mxu1 %vm189_vm4, %v603_v44 }
 0x5e6   :  { %3169 = vmatpush3.bf16.msra.mxu1 %v3687_v8  ;;  %2926 = vmatprep.mubr.msk.f32.mxu1 %vm3571_vm0, %v3572_v1 }
 0x5e7   :  { %3170 = vmatprep.subr.bf16.mxu1 %v3570_v0 }
 0x5e8   :  { %v678_v58 = vpop.permute.xlu1 %677 }
 0x5e9   :  { %2916 = vmatmul.mubr.msk.f32.vlgmr.msra.gmra.mrb[6].mxu0 %vm189_vm4, %v678_v58 }
 0x5ea   :  { %3172 = vmatpush3.bf16.msra.mxu1 %v3697_v12  ;;  %3175 = vmatpush3.bf16.msra.mxu0 %v3739_v48 }
 0x5eb   :  { %3176 = vmatprep.subr.bf16.mxu0 %v3570_v0  ;;  %2937 = vmatprep.mubr.msk.f32.mxu0 %vm3571_vm0, %v3572_v1 }
 0x5ec   :  { %3179 = vmatprep.subr.bf16.mxu1 %v3570_v0 }
 0x5ed   :  { %2927 = vmatmul.mubr.msk.f32.vlgmr.msra.gmra.mrb[6].mxu1 %vm189_vm4, %v678_v58 }
 0x5ee   :  { %3178 = vmatpush3.bf16.msra.mxu0 %v3747_v55  ;;  %3181 = vmatpush3.bf16.msra.mxu1 %v3744_v52 }
 0x5ef   :  { %3185 = vmatprep.subr.bf16.mxu0 %v3570_v0  ;;  %3182 = vmatprep.subr.bf16.mxu1 %v3570_v0 }
 0x5f0   :  { %2948 = vmatprep.mubr.msk.f32.mxu1 %vm3571_vm0, %v3572_v1 }
 0x5f2   :  { %3184 = vmatpush3.bf16.msra.mxu1 %v3751_v56 }
 0x5f3   :  { %3191 = vmatprep.subr.bf16.mxu1 %v3570_v0 }
 0x6b8   :  { %v672_v59 = vpop.f32.mrb[4].mxu1 }
 0x6b9   :  { %v2906_v60 = vpop.f32.mrb[5].mxu1 }
 0x6bc   :  { %v747_v61 = vpop.f32.mrb[6].mxu0 }
 0x6bd   :  { %v748_v62 = vadd.f32 %v747_v61, %v672_v59  ;;  %v2917_v2 = vpop.f32.mrb[7].mxu0 }
 0x6bf   :  { %v751_v3 = vadd.f32 %v3784_v63, %v748_v62 }
 0x6c0   :  { %v843_v4 = vpop.f32.mrb[6].mxu1 }
 0x6c1   :  { %v2677_v5 = vmul.f32 -1.442695, %v751_v3  ;;  %v848_v6 = vrot.slane %v843_v4, 6  ;;  %v849_v7 = vrot.slane %v843_v4, 7  ;;  %v2928_v9 = vpop.f32.mrb[7].mxu1 }
 0x6c3   :  { %3328 = vpow2.f32 %v2677_v5  ;;  %v852_v10 = vadd.f32 %v848_v6, %v3712_v16  ;;  %v853_v11 = vadd.f32 %v849_v7, %v3714_v17 }
 0x6c5   :  { %v2679_v13 = vmul.f32 -1.442695, %v852_v10  ;;  %v2680_v14 = vmul.f32 -1.442695, %v853_v11 }
 0x6c7   :  { %3330 = vpow2.f32 %v2679_v13 }
 0x6c8   :  { %3332 = vpow2.f32 %v2680_v14 }
 0x6c9   :  { %3334 = vtanh.f32 %v751_v3 }
 0x6ca   :  { %3336 = vtanh.f32 %v852_v10 }
 0x6cd   :  { %v3329_v15 = vpop.eup %3328 }
 0x6ce   :  { %v755_v18 = vadd.f32 1.0, %v3329_v15 }
 0x6d0   :  { %3338 = vrcp.f32 %v755_v18 }
 0x6d1   :  { %v3331_v19 = vpop.eup %3330  ;;  %3340 = vtanh.f32 %v853_v11 }
 0x6d2   :  { %v3333_v20 = vpop.eup %3332  ;;  %v860_v21 = vadd.f32 1.0, %v3331_v19 }
 0x6d3   :  { %v861_v22 = vadd.f32 1.0, %v3333_v20  ;;  %v3335_v23 = vpop.eup %3334 }
 0x6d4   :  { %3342 = vrcp.f32 %v860_v21  ;;  %v3337_v24 = vpop.eup %3336 }
 0x6d5   :  { %3344 = vrcp.f32 %v861_v22  ;;  %v876_v29 = vrot.slane %v3337_v24, 2 }
 0x6da   :  { %v3339_v25 = vpop.eup %3338 }
 0x6db   :  { %v3341_v26 = vpop.eup %3340  ;;  %v759_v27 = vsel %vm188_vm3, %v3339_v25, %v3335_v23 }
 0x6dc   :  { %762 = vrot.lane.b32.xlu0 %v759_v27, %s3573_s3  ;;  %v877_v30 = vrot.slane %v3341_v26, 1  ;;  %v760_v42 = vmul.f32 %v759_v27, %v3799_v43 }
 0x6de   :  { %v3343_v28 = vpop.eup %3342  ;;  %v878_v36 = vsel %vm286_vm2, %v877_v30, %v876_v29 }
 0x6df   :  { %v3345_v32 = vpop.eup %3344  ;;  %v870_v33 = vrot.slane %v3343_v28, 2 }
 0x6e0   :  { %v871_v34 = vrot.slane %v3345_v32, 1 }
 0x6e2   :  { %v872_v35 = vsel %vm286_vm2, %v871_v34, %v870_v33 }
 0x6e3   :  { %v880_v37 = vsel %vm188_vm3, %v872_v35, %v878_v36 }
 0x6e4   :  { %883 = vrot.lane.b32.xlu1 %v880_v37, %s3573_s3  ;;  %v881_v49 = vmul.f32 %v880_v37, %v3803_v47 }
 0x74e   :  { %v763_v38 = vpop.permute.xlu0 %762 }
 0x74f   :  { %v765_v39 = vmul.f32 %v763_v38, %v759_v27 }
 0x751   :  { %767 = vrot.lane.b32.xlu0 %v765_v39, %s3573_s3 }
 0x756   :  { %v884_v40 = vpop.permute.xlu1 %883 }
 0x757   :  { %v886_v41 = vmul.f32 %v884_v40, %v880_v37 }
 0x759   :  { %888 = vrot.lane.b32.xlu1 %v886_v41, %s3573_s3 }
 0x7c3   :  { %v768_v45 = vpop.permute.xlu0 %767 }
 0x7c4   :  { %v3845_v46 = vadd.f32 %v768_v45, %v760_v42 }
 0x7c6   :  { %3346 = vtanh.f32 %v3845_v46 }
 0x7cb   :  { %v889_v50 = vpop.permute.xlu1 %888 }
 0x7cc   :  { %v3849_v51 = vadd.f32 %v889_v50, %v881_v49 }
 0x7ce   :  { %3348 = vtanh.f32 %v3849_v51 }
 0x7d0   :  { %v3347_v53 = vpop.eup %3346 }
 0x7d1   :  { %773 = vrot.lane.b32.xlu0 %v3347_v53, %s3573_s3 }
 0x7d8   :  { %v3349_v54 = vpop.eup %3348 }
 0x7d9   :  { %894 = vrot.lane.b32.xlu1 %v3349_v54, %s3573_s3 }
 0x843   :  { %v774_v57 = vpop.permute.xlu0 %773 }
 0x844   :  { %v776_v43 = vmul.f32 %v774_v57, %v759_v27 }
 0x846   :  { %899 = vrot.lane.b32.xlu0 %v776_v43, %s3574_s5 }
 0x84b   :  { %v895_v44 = vpop.permute.xlu1 %894 }
 0x84c   :  { %v897_v58 = vmul.f32 %v895_v44, %v880_v37 }
 0x84e   :  { %974 = vrot.lane.b32.xlu1 %v897_v58, %s3574_s5 }
 0x8b8   :  { %v900_v47 = vpop.permute.xlu0 %899 }
 0x8b9   :  { %2938 = vmatmul.mubr.msk.f32.vlgmr.msra.gmra.mrb[8].mxu0 %vm189_vm4, %v900_v47 }
 0x8ba   :  { %3187 = vmatpush3.bf16.msra.mxu0 %v3687_v8  ;;  %2959 = vmatprep.mubr.msk.f32.mxu0 %vm3571_vm0, %v3572_v1 }
 0x8bb   :  { %3188 = vmatprep.subr.bf16.mxu0 %v3570_v0 }
 0x8be   :  { %3190 = vmatpush3.bf16.msra.mxu0 %v3697_v12 }
 0x8bf   :  { %3197 = vmatprep.subr.bf16.mxu0 %v3570_v0 }
 0x8c0   :  { %v975_v59 = vpop.permute.xlu1 %974 }
 0x8c1   :  { %2949 = vmatmul.mubr.msk.f32.vlgmr.msra.gmra.mrb[8].mxu1 %vm189_vm4, %v975_v59  ;;  %2960 = vmatmul.mubr.msk.f32.vlgmr.msra.gmra.mrb[10].mxu0 %vm189_vm4, %v975_v59 }
 0x8c2   :  { %3193 = vmatpush3.bf16.msra.mxu1 %v3739_v48  ;;  %3199 = vmatpush3.bf16.msra.mxu0 %v3744_v52 }
 0x8c3   :  { %3194 = vmatprep.subr.bf16.mxu1 %v3570_v0  ;;  %2970 = vmatprep.mubr.msk.f32.mxu1 %vm3571_vm0, %v3572_v1 }
 0x8c4   :  { %3200 = vmatprep.subr.bf16.mxu0 %v3570_v0  ;;  %2981 = vmatprep.mubr.msk.f32.mxu0 %vm3571_vm0, %v3572_v1 }
 0x8c6   :  { %3196 = vmatpush3.bf16.msra.mxu1 %v3747_v55  ;;  %3202 = vmatpush3.bf16.msra.mxu0 %v3751_v56 }
 0x8c7   :  { %3203 = vmatprep.subr.bf16.mxu1 %v3570_v0  ;;  %3209 = vmatprep.subr.bf16.mxu0 %v3570_v0 }
 0x98c   :  { %v969_v60 = vpop.f32.mrb[8].mxu0 }
 0x98d   :  { %v2939_v61 = vpop.f32.mrb[9].mxu0 }
 0x994   :  { %v1044_v62 = vpop.f32.mrb[8].mxu1  ;;  %v1140_v2 = vpop.f32.mrb[10].mxu0 }
 0x995   :  { %v1045_v3 = vadd.f32 %v1044_v62, %v969_v60  ;;  %v1145_v4 = vrot.slane %v1140_v2, 5  ;;  %v1146_v5 = vrot.slane %v1140_v2, 6  ;;  %v2950_v6 = vpop.f32.mrb[9].mxu1  ;;  %v2961_v7 = vpop.f32.mrb[11].mxu0 }
 0x997   :  { %v1048_v9 = vadd.f32 %v3784_v63, %v1045_v3  ;;  %v1149_v10 = vadd.f32 %v1145_v4, %v3712_v16  ;;  %v1150_v11 = vadd.f32 %v1146_v5, %v3714_v17 }
 0x999   :  { %v2683_v13 = vmul.f32 -1.442695, %v1048_v9  ;;  %v2685_v14 = vmul.f32 -1.442695, %v1149_v10  ;;  %v2686_v15 = vmul.f32 -1.442695, %v1150_v11 }
 0x99b   :  { %3350 = vpow2.f32 %v2683_v13 }
 0x99c   :  { %3352 = vpow2.f32 %v2685_v14 }
 0x99d   :  { %3354 = vpow2.f32 %v2686_v15 }
 0x99e   :  { %3356 = vtanh.f32 %v1149_v10 }
 0x99f   :  { %3358 = vtanh.f32 %v1150_v11 }
 0x9a0   :  { %3360 = vtanh.f32 %v1048_v9 }
 0x9a5   :  { %v3351_v18 = vpop.eup %3350 }
 0x9a6   :  { %v3353_v19 = vpop.eup %3352  ;;  %v1052_v20 = vadd.f32 1.0, %v3351_v18 }
 0x9a7   :  { %v3355_v21 = vpop.eup %3354  ;;  %v1157_v22 = vadd.f32 1.0, %v3353_v19 }
 0x9a8   :  { %3362 = vrcp.f32 %v1052_v20  ;;  %v1158_v23 = vadd.f32 1.0, %v3355_v21  ;;  %v3357_v24 = vpop.eup %3356 }
 0x9a9   :  { %3364 = vrcp.f32 %v1157_v22  ;;  %v3359_v25 = vpop.eup %3358  ;;  %v1173_v29 = vrot.slane %v3357_v24, 3 }
 0x9aa   :  { %3366 = vrcp.f32 %v1158_v23  ;;  %v3361_v26 = vpop.eup %3360  ;;  %v1174_v30 = vrot.slane %v3359_v25, 2 }
 0x9ac   :  { %v1175_v37 = vsel %vm286_vm2, %v1174_v30, %v1173_v29 }
 0x9b2   :  { %v3363_v27 = vpop.eup %3362 }
 0x9b3   :  { %v3365_v28 = vpop.eup %3364  ;;  %v1056_v32 = vsel %vm188_vm3, %v3363_v27, %v3361_v26 }
 0x9b4   :  { %v3367_v33 = vpop.eup %3366  ;;  %1059 = vrot.lane.b32.xlu0 %v1056_v32, %s3573_s3  ;;  %v1167_v34 = vrot.slane %v3365_v28, 3  ;;  %v1057_v45 = vmul.f32 %v1056_v32, %v3845_v46 }
 0x9b5   :  { %v1168_v35 = vrot.slane %v3367_v33, 2 }
 0x9b7   :  { %v1169_v36 = vsel %vm286_vm2, %v1168_v35, %v1167_v34 }
 0x9b8   :  { %v1177_v38 = vsel %vm188_vm3, %v1169_v36, %v1175_v37 }
 0x9b9   :  { %1180 = vrot.lane.b32.xlu1 %v1177_v38, %s3573_s3  ;;  %v1178_v53 = vmul.f32 %v1177_v38, %v3849_v51 }
 0xa26   :  { %v1060_v39 = vpop.permute.xlu0 %1059 }
 0xa27   :  { %v1062_v40 = vmul.f32 %v1060_v39, %v1056_v32 }
 0xa29   :  { %1064 = vrot.lane.b32.xlu0 %v1062_v40, %s3573_s3 }
 0xa2b   :  { %v1181_v41 = vpop.permute.xlu1 %1180 }
 0xa2c   :  { %v1183_v42 = vmul.f32 %v1181_v41, %v1177_v38 }
 0xa2e   :  { %1185 = vrot.lane.b32.xlu1 %v1183_v42, %s3573_s3 }
 0xa9b   :  { %v1065_v49 = vpop.permute.xlu0 %1064 }
 0xa9c   :  { %v3891_v50 = vadd.f32 %v1065_v49, %v1057_v45 }
 0xa9e   :  { %3368 = vtanh.f32 %v3891_v50 }
 0xaa0   :  { %v1186_v54 = vpop.permute.xlu1 %1185 }
 0xaa1   :  { %v3895_v57 = vadd.f32 %v1186_v54, %v1178_v53 }
 0xaa3   :  { %3370 = vtanh.f32 %v3895_v57 }
 0xaa8   :  { %v3369_v43 = vpop.eup %3368 }
 0xaa9   :  { %1070 = vrot.lane.b32.xlu0 %v3369_v43, %s3573_s3 }
 0xaad   :  { %v3371_v44 = vpop.eup %3370 }
 0xaae   :  { %1191 = vrot.lane.b32.xlu1 %v3371_v44, %s3573_s3 }
 0xb1b   :  { %v1071_v58 = vpop.permute.xlu0 %1070 }
 0xb1c   :  { %v1073_v46 = vmul.f32 %v1071_v58, %v1056_v32 }
 0xb1e   :  { %1196 = vrot.lane.b32.xlu0 %v1073_v46, %s3574_s5 }
 0xb20   :  { %v1192_v47 = vpop.permute.xlu1 %1191 }
 0xb21   :  { %v1194_v59 = vmul.f32 %v1192_v47, %v1177_v38 }
 0xb23   :  { %1271 = vrot.lane.b32.xlu1 %v1194_v59, %s3574_s5 }
 0xb90   :  { %v1197_v51 = vpop.permute.xlu0 %1196 }
 0xb91   :  { %2971 = vmatmul.mubr.msk.f32.vlgmr.msra.gmra.mrb[10].mxu1 %vm189_vm4, %v1197_v51 }
 0xb92   :  { %3205 = vmatpush3.bf16.msra.mxu1 %v3687_v8  ;;  %2992 = vmatprep.mubr.msk.f32.mxu1 %vm3571_vm0, %v3572_v1 }
 0xb93   :  { %3206 = vmatprep.subr.bf16.mxu1 %v3570_v0 }
 0xb95   :  { %v1272_v60 = vpop.permute.xlu1 %1271 }
 0xb96   :  { %2982 = vmatmul.mubr.msk.f32.vlgmr.msra.gmra.mrb[12].mxu0 %vm189_vm4, %v1272_v60  ;;  %3208 = vmatpush3.bf16.msra.mxu1 %v3697_v12 }
 0xb97   :  { %3211 = vmatpush3.bf16.msra.mxu0 %v3739_v48  ;;  %3003 = vmatprep.mubr.msk.f32.mxu0 %vm3571_vm0, %v3572_v1 }
 0xb98   :  { %3212 = vmatprep.subr.bf16.mxu0 %v3570_v0  ;;  %3215 = vmatprep.subr.bf16.mxu1 %v3570_v0 }
 0xb99   :  { %2993 = vmatmul.mubr.msk.f32.vlgmr.msra.gmra.mrb[12].mxu1 %vm189_vm4, %v1272_v60 }
 0xb9a   :  { %3217 = vmatpush3.bf16.msra.mxu1 %v3744_v52  ;;  %3014 = vmatprep.mubr.msk.f32.mxu1 %vm3571_vm0, %v3572_v1 }
 0xb9b   :  { %3214 = vmatpush3.bf16.msra.mxu0 %v3747_v55  ;;  %3218 = vmatprep.subr.bf16.mxu1 %v3570_v0 }
 0xb9c   :  { %3221 = vmatprep.subr.bf16.mxu0 %v3570_v0 }
 0xb9e   :  { %3220 = vmatpush3.bf16.msra.mxu1 %v3751_v56 }
 0xb9f   :  { %3227 = vmatprep.subr.bf16.mxu1 %v3570_v0 }
 0xc64   :  { %v1266_v61 = vpop.f32.mrb[10].mxu1 }
 0xc65   :  { %v2972_v62 = vpop.f32.mrb[11].mxu1 }
 0xc69   :  { %v1341_v2 = vpop.f32.mrb[12].mxu0 }
 0xc6a   :  { %v1342_v3 = vadd.f32 %v1341_v2, %v1266_v61  ;;  %v2983_v4 = vpop.f32.mrb[13].mxu0 }
 0xc6c   :  { %v1345_v5 = vadd.f32 %v3784_v63, %v1342_v3  ;;  %v1437_v6 = vpop.f32.mrb[12].mxu1 }
 0xc6d   :  { %v1442_v7 = vrot.slane %v1437_v6, 4  ;;  %v1443_v9 = vrot.slane %v1437_v6, 5  ;;  %v2994_v10 = vpop.f32.mrb[13].mxu1 }
 0xc6e   :  { %v2689_v11 = vmul.f32 -1.442695, %v1345_v5 }
 0xc6f   :  { %v1446_v13 = vadd.f32 %v1442_v7, %v3712_v16  ;;  %v1447_v14 = vadd.f32 %v1443_v9, %v3714_v17 }
 0xc70   :  { %3372 = vpow2.f32 %v2689_v11 }
 0xc71   :  { %v2691_v15 = vmul.f32 -1.442695, %v1446_v13  ;;  %v2692_v18 = vmul.f32 -1.442695, %v1447_v14 }
 0xc73   :  { %3374 = vpow2.f32 %v2691_v15 }
 0xc74   :  { %3376 = vpow2.f32 %v2692_v18 }
 0xc75   :  { %3378 = vtanh.f32 %v1345_v5 }
 0xc76   :  { %3380 = vtanh.f32 %v1446_v13 }
 0xc77   :  { %3382 = vtanh.f32 %v1447_v14 }
 0xc7a   :  { %v3373_v19 = vpop.eup %3372 }
 0xc7b   :  { %v1349_v20 = vadd.f32 1.0, %v3373_v19 }
 0xc7d   :  { %v3375_v21 = vpop.eup %3374  ;;  %3384 = vrcp.f32 %v1349_v20 }
 0xc7e   :  { %v3377_v22 = vpop.eup %3376  ;;  %v1454_v23 = vadd.f32 1.0, %v3375_v21 }
 0xc7f   :  { %v1455_v24 = vadd.f32 1.0, %v3377_v22  ;;  %v3379_v25 = vpop.eup %3378 }
 0xc80   :  { %3386 = vrcp.f32 %v1454_v23  ;;  %v3381_v26 = vpop.eup %3380 }
 0xc81   :  { %3388 = vrcp.f32 %v1455_v24  ;;  %v3383_v27 = vpop.eup %3382  ;;  %v1470_v32 = vrot.slane %v3381_v26, 4 }
 0xc82   :  { %v1471_v33 = vrot.slane %v3383_v27, 3 }
 0xc84   :  { %v1472_v38 = vsel %vm286_vm2, %v1471_v33, %v1470_v32 }
 0xc87   :  { %v3385_v28 = vpop.eup %3384 }
 0xc88   :  { %v1353_v29 = vsel %vm188_vm3, %v3385_v28, %v3379_v25 }
 0xc89   :  { %1356 = vrot.lane.b32.xlu0 %v1353_v29, %s3573_s3  ;;  %v1354_v49 = vmul.f32 %v1353_v29, %v3891_v50 }
 0xc8a   :  { %v3387_v30 = vpop.eup %3386 }
 0xc8b   :  { %v3389_v34 = vpop.eup %3388  ;;  %v1464_v35 = vrot.slane %v3387_v30, 4 }
 0xc8c   :  { %v1465_v36 = vrot.slane %v3389_v34, 3 }
 0xc8e   :  { %v1466_v37 = vsel %vm286_vm2, %v1465_v36, %v1464_v35 }
 0xc8f   :  { %v1474_v39 = vsel %vm188_vm3, %v1466_v37, %v1472_v38 }
 0xc90   :  { %1477 = vrot.lane.b32.xlu1 %v1474_v39, %s3573_s3  ;;  %v1475_v43 = vmul.f32 %v1474_v39, %v3895_v57 }
 0xcfb   :  { %v1357_v40 = vpop.permute.xlu0 %1356 }
 0xcfc   :  { %v1359_v41 = vmul.f32 %v1357_v40, %v1353_v29 }
 0xcfe   :  { %1361 = vrot.lane.b32.xlu0 %v1359_v41, %s3573_s3 }
 0xd02   :  { %v1478_v42 = vpop.permute.xlu1 %1477 }
 0xd03   :  { %v1480_v45 = vmul.f32 %v1478_v42, %v1474_v39 }
 0xd05   :  { %1482 = vrot.lane.b32.xlu1 %v1480_v45, %s3573_s3 }
 0xd70   :  { %v1362_v53 = vpop.permute.xlu0 %1361 }
 0xd71   :  { %v3937_v54 = vadd.f32 %v1362_v53, %v1354_v49 }
 0xd73   :  { %3390 = vtanh.f32 %v3937_v54 }
 0xd77   :  { %v1483_v44 = vpop.permute.xlu1 %1482 }
 0xd78   :  { %v3941_v58 = vadd.f32 %v1483_v44, %v1475_v43 }
 0xd7a   :  { %3392 = vtanh.f32 %v3941_v58 }
 0xd7d   :  { %v3391_v46 = vpop.eup %3390 }
 0xd7e   :  { %1367 = vrot.lane.b32.xlu0 %v3391_v46, %s3573_s3 }
 0xd84   :  { %v3393_v47 = vpop.eup %3392 }
 0xd85   :  { %1488 = vrot.lane.b32.xlu1 %v3393_v47, %s3573_s3 }
 0xdf0   :  { %v1368_v59 = vpop.permute.xlu0 %1367 }
 0xdf1   :  { %v1370_v50 = vmul.f32 %v1368_v59, %v1353_v29 }
 0xdf3   :  { %1493 = vrot.lane.b32.xlu0 %v1370_v50, %s3574_s5 }
 0xdf7   :  { %v1489_v51 = vpop.permute.xlu1 %1488 }
 0xdf8   :  { %v1491_v60 = vmul.f32 %v1489_v51, %v1474_v39 }
 0xdfa   :  { %1568 = vrot.lane.b32.xlu1 %v1491_v60, %s3574_s5 }
 0xe65   :  { %v1494_v57 = vpop.permute.xlu0 %1493 }
 0xe66   :  { %3004 = vmatmul.mubr.msk.f32.vlgmr.msra.gmra.mrb[14].mxu0 %vm189_vm4, %v1494_v57 }
 0xe67   :  { %3223 = vmatpush3.bf16.msra.mxu0 %v3687_v8  ;;  %3025 = vmatprep.mubr.msk.f32.mxu0 %vm3571_vm0, %v3572_v1 }
 0xe68   :  { %3224 = vmatprep.subr.bf16.mxu0 %v3570_v0 }
 0xe6b   :  { %3226 = vmatpush3.bf16.msra.mxu0 %v3697_v12 }
 0xe6c   :  { %v1569_v61 = vpop.permute.xlu1 %1568  ;;  %3233 = vmatprep.subr.bf16.mxu0 %v3570_v0 }
 0xe6d   :  { %3015 = vmatmul.mubr.msk.f32.vlgmr.msra.gmra.mrb[14].mxu1 %vm189_vm4, %v1569_v61 }
 0xe6e   :  { %3026 = vmatmul.mubr.msk.f32.vlgmr.msra.gmra.mrb[16].mxu0 %vm189_vm4, %v1569_v61  ;;  %3229 = vmatpush3.bf16.msra.mxu1 %v3739_v48 }
 0xe6f   :  { %3230 = vmatprep.subr.bf16.mxu1 %v3570_v0  ;;  %3235 = vmatpush3.bf16.msra.mxu0 %v3744_v52 }
 0xe70   :  { %3036 = vmatprep.mubr.msk.f32.mxu1 %vm3571_vm0, %v3572_v1  ;;  %3236 = vmatprep.subr.bf16.mxu0 %v3570_v0 }
 0xe71   :  { %3047 = vmatprep.mubr.msk.f32.mxu0 %vm3571_vm0, %v3572_v1 }
 0xe72   :  { %3232 = vmatpush3.bf16.msra.mxu1 %v3747_v55 }
 0xe73   :  { %3239 = vmatprep.subr.bf16.mxu1 %v3570_v0  ;;  %3238 = vmatpush3.bf16.msra.mxu0 %v3751_v56 }
 0xe74   :  { %3245 = vmatprep.subr.bf16.mxu0 %v3570_v0 }
 0xf39   :  { %v1563_v62 = vpop.f32.mrb[14].mxu0 }
 0xf3a   :  { %v3005_v2 = vpop.f32.mrb[15].mxu0 }
 0xf40   :  { %v1638_v3 = vpop.f32.mrb[14].mxu1 }
 0xf41   :  { %v1639_v4 = vadd.f32 %v1638_v3, %v1563_v62  ;;  %v1734_v5 = vpop.f32.mrb[16].mxu0  ;;  %v3016_v6 = vpop.f32.mrb[15].mxu1 }
 0xf42   :  { %v1739_v7 = vrot.slane %v1734_v5, 3  ;;  %v1740_v9 = vrot.slane %v1734_v5, 4  ;;  %v3027_v10 = vpop.f32.mrb[17].mxu0 }
 0xf43   :  { %v1642_v11 = vadd.f32 %v3784_v63, %v1639_v4 }
 0xf44   :  { %v1743_v13 = vadd.f32 %v1739_v7, %v3712_v16  ;;  %v1744_v14 = vadd.f32 %v1740_v9, %v3714_v17 }
 0xf45   :  { %v2695_v15 = vmul.f32 -1.442695, %v1642_v11 }
 0xf46   :  { %v2697_v18 = vmul.f32 -1.442695, %v1743_v13  ;;  %v2698_v19 = vmul.f32 -1.442695, %v1744_v14 }
 0xf47   :  { %3394 = vpow2.f32 %v2695_v15 }
 0xf48   :  { %3396 = vpow2.f32 %v2697_v18 }
 0xf49   :  { %3398 = vpow2.f32 %v2698_v19 }
 0xf4a   :  { %3400 = vtanh.f32 %v1743_v13 }
 0xf4b   :  { %3402 = vtanh.f32 %v1744_v14 }
 0xf4c   :  { %3404 = vtanh.f32 %v1642_v11 }
 0xf51   :  { %v3395_v20 = vpop.eup %3394 }
 0xf52   :  { %v3397_v21 = vpop.eup %3396  ;;  %v1646_v22 = vadd.f32 1.0, %v3395_v20 }
 0xf53   :  { %v3399_v23 = vpop.eup %3398  ;;  %v1751_v24 = vadd.f32 1.0, %v3397_v21 }
 0xf54   :  { %3406 = vrcp.f32 %v1646_v22  ;;  %v1752_v25 = vadd.f32 1.0, %v3399_v23  ;;  %v3401_v26 = vpop.eup %3400 }
 0xf55   :  { %3408 = vrcp.f32 %v1751_v24  ;;  %v3403_v27 = vpop.eup %3402  ;;  %v1767_v32 = vrot.slane %v3401_v26, 5 }
 0xf56   :  { %3410 = vrcp.f32 %v1752_v25  ;;  %v3405_v28 = vpop.eup %3404  ;;  %v1768_v33 = vrot.slane %v3403_v27, 4 }
 0xf58   :  { %v1769_v39 = vsel %vm286_vm2, %v1768_v33, %v1767_v32 }
 0xf5e   :  { %v3407_v29 = vpop.eup %3406 }
 0xf5f   :  { %v3409_v30 = vpop.eup %3408  ;;  %v1650_v34 = vsel %vm188_vm3, %v3407_v29, %v3405_v28 }
 0xf60   :  { %v3411_v35 = vpop.eup %3410  ;;  %1653 = vrot.lane.b32.xlu0 %v1650_v34, %s3573_s3  ;;  %v1761_v36 = vrot.slane %v3409_v30, 5  ;;  %v1651_v53 = vmul.f32 %v1650_v34, %v3937_v54 }
 0xf61   :  { %v1762_v37 = vrot.slane %v3411_v35, 4 }
 0xf63   :  { %v1763_v38 = vsel %vm286_vm2, %v1762_v37, %v1761_v36 }
 0xf64   :  { %v1771_v40 = vsel %vm188_vm3, %v1763_v38, %v1769_v39 }
 0xf65   :  { %1774 = vrot.lane.b32.xlu1 %v1771_v40, %s3573_s3  ;;  %v1772_v46 = vmul.f32 %v1771_v40, %v3941_v58 }
 0xfd2   :  { %v1654_v41 = vpop.permute.xlu0 %1653 }
 0xfd3   :  { %v1656_v42 = vmul.f32 %v1654_v41, %v1650_v34 }
 0xfd5   :  { %1658 = vrot.lane.b32.xlu0 %v1656_v42, %s3573_s3 }
 0xfd7   :  { %v1775_v45 = vpop.permute.xlu1 %1774 }
 0xfd8   :  { %v1777_v49 = vmul.f32 %v1775_v45, %v1771_v40 }
 0xfda   :  { %1779 = vrot.lane.b32.xlu1 %v1777_v49, %s3573_s3 }
0x1047   :  { %v1659_v43 = vpop.permute.xlu0 %1658 }
0x1048   :  { %v3983_v44 = vadd.f32 %v1659_v43, %v1651_v53 }
0x104a   :  { %3412 = vtanh.f32 %v3983_v44 }
0x104c   :  { %v1780_v47 = vpop.permute.xlu1 %1779 }
0x104d   :  { %v3987_v59 = vadd.f32 %v1780_v47, %v1772_v46 }
0x104f   :  { %3414 = vtanh.f32 %v3987_v59 }
0x1054   :  { %v3413_v50 = vpop.eup %3412 }
0x1055   :  { %1664 = vrot.lane.b32.xlu0 %v3413_v50, %s3573_s3 }
0x1059   :  { %v3415_v51 = vpop.eup %3414 }
0x105a   :  { %1785 = vrot.lane.b32.xlu1 %v3415_v51, %s3573_s3 }
0x10c7   :  { %v1665_v60 = vpop.permute.xlu0 %1664 }
0x10c8   :  { %v1667_v54 = vmul.f32 %v1665_v60, %v1650_v34 }
0x10ca   :  { %1790 = vrot.lane.b32.xlu0 %v1667_v54, %s3574_s5 }
0x10cc   :  { %v1786_v57 = vpop.permute.xlu1 %1785 }
0x10cd   :  { %v1788_v61 = vmul.f32 %v1786_v57, %v1771_v40 }
0x10cf   :  { %1865 = vrot.lane.b32.xlu1 %v1788_v61, %s3574_s5 }
0x113c   :  { %v1791_v58 = vpop.permute.xlu0 %1790 }
0x113d   :  { %3037 = vmatmul.mubr.msk.f32.vlgmr.msra.gmra.mrb[16].mxu1 %vm189_vm4, %v1791_v58 }
0x113e   :  { %3241 = vmatpush3.bf16.msra.mxu1 %v3687_v8  ;;  %3058 = vmatprep.mubr.msk.f32.mxu1 %vm3571_vm0, %v3572_v1 }
0x113f   :  { %3242 = vmatprep.subr.bf16.mxu1 %v3570_v0 }
0x1141   :  { %v1866_v62 = vpop.permute.xlu1 %1865 }
0x1142   :  { %3048 = vmatmul.mubr.msk.f32.vlgmr.msra.gmra.mrb[18].mxu0 %vm189_vm4, %v1866_v62  ;;  %3244 = vmatpush3.bf16.msra.mxu1 %v3697_v12 }
0x1143   :  { %3247 = vmatpush3.bf16.msra.mxu0 %v3739_v48  ;;  %3069 = vmatprep.mubr.msk.f32.mxu0 %vm3571_vm0, %v3572_v1 }
0x1144   :  { %3248 = vmatprep.subr.bf16.mxu0 %v3570_v0  ;;  %3251 = vmatprep.subr.bf16.mxu1 %v3570_v0 }
0x1145   :  { %3059 = vmatmul.mubr.msk.f32.vlgmr.msra.gmra.mrb[18].mxu1 %vm189_vm4, %v1866_v62 }
0x1146   :  { %3253 = vmatpush3.bf16.msra.mxu1 %v3744_v52  ;;  %3080 = vmatprep.mubr.msk.f32.mxu1 %vm3571_vm0, %v3572_v1 }
0x1147   :  { %3250 = vmatpush3.bf16.msra.mxu0 %v3747_v55  ;;  %3254 = vmatprep.subr.bf16.mxu1 %v3570_v0 }
0x1148   :  { %3257 = vmatprep.subr.bf16.mxu0 %v3570_v0 }
0x114a   :  { %3256 = vmatpush3.bf16.msra.mxu1 %v3751_v56 }
0x114b   :  { %3263 = vmatprep.subr.bf16.mxu1 %v3570_v0 }
0x1210   :  { %v1860_v2 = vpop.f32.mrb[16].mxu1 }
0x1211   :  { %v3038_v3 = vpop.f32.mrb[17].mxu1 }
0x1215   :  { %v1935_v4 = vpop.f32.mrb[18].mxu0 }
0x1216   :  { %v1936_v5 = vadd.f32 %v1935_v4, %v1860_v2  ;;  %v3049_v6 = vpop.f32.mrb[19].mxu0 }
0x1218   :  { %v1939_v7 = vadd.f32 %v3784_v63, %v1936_v5  ;;  %v2031_v9 = vpop.f32.mrb[18].mxu1 }
0x1219   :  { %v2036_v10 = vrot.slane %v2031_v9, 2  ;;  %v2037_v11 = vrot.slane %v2031_v9, 3  ;;  %v3060_v13 = vpop.f32.mrb[19].mxu1 }
0x121a   :  { %v2701_v14 = vmul.f32 -1.442695, %v1939_v7 }
0x121b   :  { %v2040_v15 = vadd.f32 %v2036_v10, %v3712_v16  ;;  %v2041_v18 = vadd.f32 %v2037_v11, %v3714_v17 }
0x121c   :  { %3416 = vpow2.f32 %v2701_v14 }
0x121d   :  { %v2703_v19 = vmul.f32 -1.442695, %v2040_v15  ;;  %v2704_v20 = vmul.f32 -1.442695, %v2041_v18 }
0x121f   :  { %3418 = vpow2.f32 %v2703_v19 }
0x1220   :  { %3420 = vpow2.f32 %v2704_v20 }
0x1221   :  { %3422 = vtanh.f32 %v1939_v7  ;;  %v4063_v7 = vld [vmem:[%s4130_s6] ss:$0 sm:$0xff] }
0x1222   :  { %3424 = vtanh.f32 %v2040_v15 }
0x1223   :  { %3426 = vtanh.f32 %v2041_v18 }
0x1226   :  { %v3417_v21 = vpop.eup %3416 }
0x1227   :  { %v1943_v22 = vadd.f32 1.0, %v3417_v21 }
0x1229   :  { %v3419_v63 = vpop.eup %3418  ;;  %3428 = vrcp.f32 %v1943_v22 }
0x122a   :  { %v3421_v23 = vpop.eup %3420  ;;  %v2048_v24 = vadd.f32 1.0, %v3419_v63 }
0x122b   :  { %v2049_v25 = vadd.f32 1.0, %v3421_v23  ;;  %v3423_v26 = vpop.eup %3422 }
0x122c   :  { %3430 = vrcp.f32 %v2048_v24  ;;  %v3425_v27 = vpop.eup %3424 }
0x122d   :  { %3432 = vrcp.f32 %v2049_v25  ;;  %v3427_v28 = vpop.eup %3426  ;;  %v2064_v33 = vrot.slane %v3425_v27, 6 }
0x122e   :  { %v2065_v34 = vrot.slane %v3427_v28, 5 }
0x1230   :  { %v2066_v39 = vsel %vm286_vm2, %v2065_v34, %v2064_v33 }
0x1233   :  { %v3429_v29 = vpop.eup %3428 }
0x1234   :  { %v1947_v30 = vsel %vm188_vm3, %v3429_v29, %v3423_v26 }
0x1235   :  { %1950 = vrot.lane.b32.xlu0 %v1947_v30, %s3573_s3  ;;  %v1948_v53 = vmul.f32 %v1947_v30, %v3983_v44 }
0x1236   :  { %v3431_v32 = vpop.eup %3430 }
0x1237   :  { %v3433_v35 = vpop.eup %3432  ;;  %v2058_v36 = vrot.slane %v3431_v32, 6 }
0x1238   :  { %v2059_v37 = vrot.slane %v3433_v35, 5 }
0x123a   :  { %v2060_v38 = vsel %vm286_vm2, %v2059_v37, %v2058_v36 }
0x123b   :  { %v2068_v40 = vsel %vm188_vm3, %v2060_v38, %v2066_v39 }
0x123c   :  { %2071 = vrot.lane.b32.xlu1 %v2068_v40, %s3573_s3  ;;  %v2069_v47 = vmul.f32 %v2068_v40, %v3987_v59 }
0x12a7   :  { %v1951_v41 = vpop.permute.xlu0 %1950 }
0x12a8   :  { %v1953_v42 = vmul.f32 %v1951_v41, %v1947_v30 }
0x12aa   :  { %1955 = vrot.lane.b32.xlu0 %v1953_v42, %s3573_s3 }
0x12ae   :  { %v2072_v45 = vpop.permute.xlu1 %2071 }
0x12af   :  { %v2074_v49 = vmul.f32 %v2072_v45, %v2068_v40 }
0x12b1   :  { %2076 = vrot.lane.b32.xlu1 %v2074_v49, %s3573_s3 }
0x131c   :  { %v1956_v43 = vpop.permute.xlu0 %1955 }
0x131d   :  { %v4029_v46 = vadd.f32 %v1956_v43, %v1948_v53 }
0x131f   :  { %3434 = vtanh.f32 %v4029_v46 }
0x1323   :  { %v2077_v50 = vpop.permute.xlu1 %2076 }
0x1324   :  { %v4033_v51 = vadd.f32 %v2077_v50, %v2069_v47 }
0x1326   :  { %3436 = vtanh.f32 %v4033_v51 }
0x1329   :  { %v3435_v60 = vpop.eup %3434 }
0x132a   :  { %1961 = vrot.lane.b32.xlu0 %v3435_v60, %s3573_s3 }
0x1330   :  { %v3437_v54 = vpop.eup %3436 }
0x1331   :  { %2082 = vrot.lane.b32.xlu1 %v3437_v54, %s3573_s3 }
0x139c   :  { %v1962_v57 = vpop.permute.xlu0 %1961 }
0x139d   :  { %v1964_v44 = vmul.f32 %v1962_v57, %v1947_v30 }
0x139f   :  { %2087 = vrot.lane.b32.xlu0 %v1964_v44, %s3574_s5 }
0x13a3   :  { %v2083_v61 = vpop.permute.xlu1 %2082 }
0x13a4   :  { %v2085_v58 = vmul.f32 %v2083_v61, %v2068_v40 }
0x13a6   :  { %2162 = vrot.lane.b32.xlu1 %v2085_v58, %s3574_s5 }
0x1411   :  { %v2088_v59 = vpop.permute.xlu0 %2087 }
0x1412   :  { %3070 = vmatmul.mubr.msk.f32.vlgmr.msra.gmra.mrb[20].mxu0 %vm189_vm4, %v2088_v59 }
0x1413   :  { %3259 = vmatpush3.bf16.msra.mxu0 %v3687_v8  ;;  %3091 = vmatprep.mubr.msk.f32.mxu0 %vm3571_vm0, %v3572_v1 }
0x1414   :  { %3260 = vmatprep.subr.bf16.mxu0 %v3570_v0 }
0x1417   :  { %3262 = vmatpush3.bf16.msra.mxu0 %v3697_v12 }
0x1418   :  { %v2163_v62 = vpop.permute.xlu1 %2162  ;;  %3269 = vmatprep.subr.bf16.mxu0 %v3570_v0 }
0x1419   :  { %3081 = vmatmul.mubr.msk.f32.vlgmr.msra.gmra.mrb[20].mxu1 %vm189_vm4, %v2163_v62 }
0x141a   :  { %3092 = vmatmul.mubr.msk.f32.vlgmr.msra.gmra.mrb[22].mxu0 %vm189_vm4, %v2163_v62  ;;  %3265 = vmatpush3.bf16.msra.mxu1 %v3739_v48 }
0x141b   :  { %3266 = vmatprep.subr.bf16.mxu1 %v3570_v0  ;;  %3271 = vmatpush3.bf16.msra.mxu0 %v3744_v52 }
0x141c   :  { %3102 = vmatprep.mubr.msk.f32.mxu1 %vm3571_vm0, %v3572_v1  ;;  %3272 = vmatprep.subr.bf16.mxu0 %v3570_v0 }
0x141d   :  { %3113 = vmatprep.mubr.msk.f32.mxu0 %vm3571_vm0, %v3572_v1 }
0x141e   :  { %3268 = vmatpush3.bf16.msra.mxu1 %v3747_v55 }
0x141f   :  { %3274 = vmatpush3.bf16.msra.mxu0 %v3751_v56  ;;  %3275 = vmatprep.subr.bf16.mxu1 %v3570_v0 }
0x14e5   :  { %v2157_v8 = vpop.f32.mrb[20].mxu0 }
0x14e6   :  { %v3071_v12 = vpop.f32.mrb[21].mxu0 }
0x14ec   :  { %v2232_v48 = vpop.f32.mrb[20].mxu1 }
0x14ed   :  { %v2233_v2 = vadd.f32 %v2232_v48, %v2157_v8  ;;  %v2328_v3 = vpop.f32.mrb[22].mxu0  ;;  %v3082_v52 = vpop.f32.mrb[21].mxu1 }
0x14ee   :  { %v2333_v4 = vrot.slane %v2328_v3, 1  ;;  %v2334_v5 = vrot.slane %v2328_v3, 2  ;;  %v3093_v6 = vpop.f32.mrb[23].mxu0 }
0x14ef   :  { %v2236_v55 = vadd.f32 %v4063_v7, %v2233_v2 }
0x14f0   :  { %v2337_v56 = vadd.f32 %v2333_v4, %v3712_v16  ;;  %v2338_v9 = vadd.f32 %v2334_v5, %v3714_v17 }
0x14f1   :  { %v2707_v10 = vmul.f32 -1.442695, %v2236_v55 }
0x14f2   :  { %v2709_v11 = vmul.f32 -1.442695, %v2337_v56  ;;  %v2710_v13 = vmul.f32 -1.442695, %v2338_v9 }
0x14f3   :  { %3438 = vpow2.f32 %v2707_v10  ;;  %v2563_v10 = vld [vmem:[%s4131_s7 + $0x18] sm:$0xff] }
0x14f4   :  { %3440 = vpow2.f32 %v2709_v11 }
0x14f5   :  { %3442 = vpow2.f32 %v2710_v13 }
0x14f6   :  { %3444 = vtanh.f32 %v2337_v56  ;;  %v2562_v56 = vld [vmem:[%s4131_s7 + $0x10] sm:$0xff] }
0x14f7   :  { %3446 = vtanh.f32 %v2338_v9  ;;  %v3279_v11 = vpack.c.bf16 %v2563_v10, %v2562_v56 }
0x14f8   :  { %3448 = vtanh.f32 %v2236_v55  ;;  %v2560_v55 = vld [vmem:[%s4131_s7] sm:$0xff]  ;;  %s2654_s7 = sshll.u32 %s3575_s29, 4  ;;  %s2655_s7 = int_to_ptr.vmem [resolvable:$true] %s2654_s7 }
0x14f9   :  { %v3276_v9 = vpack.c.bf16 %v2561_v31, %v2560_v55  ;;  %s3537_s30 = scalar_lea.vmem %s2655_s7, 32  ;;  %p3542_p11 = scmp.lt.s32.totalorder %s2655_s7, %s2655_s7 }
0x14fa   :  { %p3538_p10 = scmp.ne.s32.totalorder %s2655_s7, %s3537_s30  ;;  %p3543_p12 = scmp.lt.s32.totalorder %s3537_s30, %s3537_s30 }
0x14fc   :  { %p3544_p13 = por %p3543_p12, %p3542_p11 }
0x14fd   :  { %v3439_v14 = vpop.eup %3438 }
0x14fe   :  { %v3441_v15 = vpop.eup %3440  ;;  %v2240_v18 = vadd.f32 1.0, %v3439_v14  ;;  %p3545_p0 = pnand %p3544_p13, %p3538_p10 }
0x14ff   :  { %v3443_v19 = vpop.eup %3442  ;;  %v2345_v20 = vadd.f32 1.0, %v3441_v15 }
0x1500   :  { %3450 = vrcp.f32 %v2240_v18  ;;  %v2346_v21 = vadd.f32 1.0, %v3443_v19  ;;  %v3445_v16 = vpop.eup %3444  ;;  %v2714_v19 = vld [vmem:[%s4132_s8] ss:$0 sm:$0xff] }
0x1501   :  { %3452 = vrcp.f32 %v2345_v20  ;;  %v3447_v17 = vpop.eup %3446  ;;  %v2361_v24 = vrot.slane %v3445_v16, 7 }
0x1502   :  { %3454 = vrcp.f32 %v2346_v21  ;;  %v3449_v22 = vpop.eup %3448  ;;  %v2362_v25 = vrot.slane %v3447_v17, 6 }
0x1504   :  { %v2363_v32 = vsel %vm286_vm2, %v2362_v25, %v2361_v24 }
0x150a   :  { %v3451_v63 = vpop.eup %3450 }
0x150b   :  { %v3453_v23 = vpop.eup %3452  ;;  %v2244_v26 = vsel %vm188_vm3, %v3451_v63, %v3449_v22 }
0x150c   :  { %v3455_v27 = vpop.eup %3454  ;;  %2247 = vrot.lane.b32.xlu0 %v2244_v26, %s3573_s3  ;;  %v2355_v28 = vrot.slane %v3453_v23, 7  ;;  %v2245_v38 = vmul.f32 %v2244_v26, %v4029_v46 }
0x150d   :  { %v2356_v29 = vrot.slane %v3455_v27, 6 }
0x150f   :  { %v2357_v30 = vsel %vm286_vm2, %v2356_v29, %v2355_v28 }
0x1510   :  { %v2365_v33 = vsel %vm188_vm3, %v2357_v30, %v2363_v32 }
0x1511   :  { %2368 = vrot.lane.b32.xlu1 %v2365_v33, %s3573_s3  ;;  %v2366_v41 = vmul.f32 %v2365_v33, %v4033_v51 }
0x157e   :  { %v2248_v34 = vpop.permute.xlu0 %2247 }
0x157f   :  { %v2250_v35 = vmul.f32 %v2248_v34, %v2244_v26 }
0x1581   :  { %2252 = vrot.lane.b32.xlu0 %v2250_v35, %s3573_s3 }
0x1583   :  { %v2369_v36 = vpop.permute.xlu1 %2368 }
0x1584   :  { %v2371_v37 = vmul.f32 %v2369_v36, %v2365_v33 }
0x1586   :  { %2373 = vrot.lane.b32.xlu1 %v2371_v37, %s3573_s3 }
0x15f3   :  { %v2253_v39 = vpop.permute.xlu0 %2252 }
0x15f4   :  { %v2255_v40 = vadd.f32 %v2253_v39, %v2245_v38 }
0x15f6   :  { %3456 = vtanh.f32 %v2255_v40 }
0x15f8   :  { %v2374_v42 = vpop.permute.xlu1 %2373 }
0x15f9   :  { %v2376_v45 = vadd.f32 %v2374_v42, %v2366_v41 }
0x15fb   :  { %3458 = vtanh.f32 %v2376_v45 }
0x1600   :  { %v3457_v49 = vpop.eup %3456 }
0x1601   :  { %2258 = vrot.lane.b32.xlu0 %v3457_v49, %s3573_s3 }
0x1605   :  { %v3459_v53 = vpop.eup %3458 }
0x1606   :  { %2379 = vrot.lane.b32.xlu1 %v3459_v53, %s3573_s3 }
0x1673   :  { %v2259_v43 = vpop.permute.xlu0 %2258 }
0x1674   :  { %v2261_v47 = vmul.f32 %v2259_v43, %v2244_v26 }
0x1676   :  { %2384 = vrot.lane.b32.xlu0 %v2261_v47, %s3574_s5 }
0x1678   :  { %v2380_v50 = vpop.permute.xlu1 %2379 }
0x1679   :  { %v2382_v46 = vmul.f32 %v2380_v50, %v2365_v33 }
0x167b   :  { %2459 = vrot.lane.b32.xlu1 %v2382_v46, %s3574_s5 }
0x16e8   :  { %v2385_v60 = vpop.permute.xlu0 %2384 }
0x16e9   :  { %3103 = vmatmul.mubr.msk.f32.vlgmr.msra.gmra.mrb[22].mxu1 %vm189_vm4, %v2385_v60 }
0x16ea   :  { %3124 = vmatprep.mubr.msk.f32.mxu1 %vm3571_vm0, %v3572_v1  ;;  %3277 = vmatpush3.bf16.msra.mxu1 %v3276_v9 }
0x16eb   :  { %3278 = vmatprep.subr.bf16.mxu1 %v3570_v0 }
0x16ed   :  { %v2460_v51 = vpop.permute.xlu1 %2459 }
0x16ee   :  { %3114 = vmatmul.mubr.msk.f32.vlgmr.msra.gmra.mrb[24].mxu0 %vm189_vm4, %v2460_v51  ;;  %3280 = vmatpush3.bf16.msra.mxu1 %v3279_v11 }
0x17bc   :  { %v2454_v54 = vpop.f32.mrb[22].mxu1 }
0x17bd   :  { %v3104_v57 = vpop.f32.mrb[23].mxu1 }
0x17c1   :  { %v2529_v44 = vpop.f32.mrb[24].mxu0 }
0x17c2   :  { %v2530_v61 = vadd.f32 %v2529_v44, %v2454_v54  ;;  %v3115_v58 = vpop.f32.mrb[25].mxu0 }
0x17c4   :  { %v2533_v59 = vadd.f32 %v4063_v7, %v2530_v61 }
0x17c6   :  { %v2713_v62 = vmul.f32 -1.442695, %v2533_v59 }
0x17c8   :  { %3460 = vpow2.f32 %v2713_v62 }
0x17c9   :  { %3462 = vtanh.f32 %v2533_v59 }
0x17d2   :  { %v3461_v8 = vpop.eup %3460 }
0x17d3   :  { %v2537_v12 = vadd.f32 1.0, %v3461_v8  ;;  %v3463_v48 = vpop.eup %3462 }
0x17d5   :  { %3464 = vrcp.f32 %v2537_v12 }
0x17df   :  { %v3465_v2 = vpop.eup %3464 }
0x17e0   :  { %v2541_v1 = vsel %vm188_vm3, %v3465_v2, %v3463_v48 }
0x17e1   :  { %2544 = vrot.lane.b32.xlu0 %v2541_v1, %s3573_s3  ;;  %v2542_v4 = vmul.f32 %v2541_v1, %v2255_v40 }
0x1853   :  { %v2545_v3 = vpop.permute.xlu0 %2544 }
0x1854   :  { %v2547_v52 = vmul.f32 %v2545_v3, %v2541_v1 }
0x1856   :  { %2549 = vrot.lane.b32.xlu1 %v2547_v52, %s3573_s3 }
0x18c8   :  { %v2550_v5 = vpop.permute.xlu1 %2549 }
0x18c9   :  { %v2552_v6 = vadd.f32 %v2550_v5, %v2542_v4 }
0x18cb   :  { %3466 = vtanh.f32 %v2552_v6 }
0x18d5   :  { %v3467_v7 = vpop.eup %3466 }
0x18d6   :  { %2555 = vrot.lane.b32.xlu0 %v3467_v7, %s3573_s3 }
0x1948   :  { %v2556_v13 = vpop.permute.xlu0 %2555 }
0x1949   :  { %v2558_v14 = vmul.f32 %v2556_v13, %v2541_v1 }
0x194b   :  { %3468 = vtanh.f32 %v2558_v14 }
0x1955   :  { %v3469_v15 = vpop.eup %3468 }
0x1956   :  { %2572 = vrot.lane.b32.xlu1 %v3469_v15, %s3574_s5 }
0x19c8   :  { %v2573_v18 = vpop.permute.xlu1 %2572 }
0x19c9   :  { %3125 = vmatmul.mubr.msk.f32.vlgmr.msra.gmra.mrb[24].mxu1 %vm189_vm4, %v2573_v18 }
0x1a9c   :  { %v2642_v20 = vpop.f32.mrb[24].mxu1 }
0x1a9d   :  { %v2643_v21 = vadd.f32 %v2714_v19, %v2642_v20  ;;  %v3126_v0 = vpop.f32.mrb[25].mxu1 }
0x1a9f   :  { %2647 = vst.msk [vmem:[#allocation8] sm:$0x3] %vm2646_vm5, %v2643_v21 }
0x1aa0   :  { %3548 = shalt.err (!%p3545_p0)
}
0x1aa1   :  { %s3549_s3 = scalar_lea.hbm %s4133_s9, 32 }
0x1aa2   :  { %p3550_p1 = scmp.ne.s32.totalorder %s4133_s9, %s3549_s3  ;;  %p3553_p2 = scmp.lt.u32.totalorder %s3549_s3, %s4133_s9 }
0x1aa4   :  { %p3555_p3 = pnand %p3553_p2, %p3550_p1 }
0x1aa6   :  { %3558 = shalt.err (!%p3555_p3)
}
0x1aa7   :  { %2657 = dma.vmem_to_hbm [thread:$0]  %s2655_s7, 32, %s4133_s9, [#allocation4]  }
0x1aa8   :  { %3563 = dma.done.wait [#allocation4], 32  }
0x1aa9   :  { %3564 = vsyncadd [#allocation4], 4294967264 }
0x1aaa   :  { %2661 = vsyncpa [#allocation3], 1 }
0x1aab   :  { %2662 = vsyncpa [#allocation6], 1 }
0x1aac   :  { %2663 = vsyncpa [#allocation4], 1 }

</bundles_post_ra>
